<compile_context>
chip_gen: v7x
topology: tpu7x:2x2x1
jax: 0.10.0
libtpu: 0.0.40
codegen_flags: <defaults>
</compile_context>

<pallas_src>
import jax
import jax.numpy as jnp
from jax.experimental import pallas as pl
from jax.experimental.pallas import tpu as pltpu

D_IN, D_H1, D_H2, D_OUT = 2, 256, 128, 1


def _round_up(n, m):
    return ((n + m - 1) // m) * m


def _pick_act_dtype():
    """bf16 fc1 on v6e/v7x (native bf16 VPU); f32 on v5e and older (no bf16 VPU/EUP)."""
    dev = jax.devices()[0]
    if dev.platform != "tpu":
        return jnp.float32
    kind = dev.device_kind.lower()
    if any(v in kind for v in ("v2", "v3", "v4", "v5")):
        return jnp.float32
    return jnp.bfloat16


def _mlp_kernel(x_ref, w1_ref, b1_ref, w2_ref, b2_ref, w3_ref, b3_ref, o_ref):
    # All activations are [features, batch]; the batch tile TB lives on the lane axis.
    xT = x_ref[...]                                   # [2, TB]    act dtype
    w1 = w1_ref[...]                                  # [256, 2]   act dtype (PyTorch [out, in])

    # fc1 + relu: K=2 contraction -> two VPU broadcast-FMAs (keeps the MXU free).
    h1 = w1[:, 0:1] * xT[0:1, :] + w1[:, 1:2] * xT[1:2, :] + b1_ref[...]
    h1 = jnp.maximum(h1, 0.0)                         # [256, TB]  act dtype

    # fc2 + relu on the MXU: [128,256] @ [256,TB].  N = TB >= 256 fills the 256-wide
    # v6e/v7x MXU; bf16 operands, f32 accumulation; bias/relu stay f32.
    h2 = jnp.dot(w2_ref[...], h1.astype(w2_ref.dtype),
                 preferred_element_type=jnp.float32) + b2_ref[...]
    h2 = jnp.maximum(h2, 0.0)                         # [128, TB]  f32

    # fc3 as a lane-parallel MXU matvec: [1,128] @ [128,TB] -> lane-dense [1,TB].
    # Keeps the reduction off the VPU/XLU; the MXU has slack after fc2.
    z = jnp.dot(w3_ref[...], h2.astype(w3_ref.dtype),
                preferred_element_type=jnp.float32) + b3_ref[...]   # [1, TB] f32

    # Sigmoid epilogue over full vregs (exp runs on the EUP slot); lane-dense store.
    o_ref[...] = 1.0 / (1.0 + jnp.exp(-z))


def dbn_like_forward(x, params, *, block_rows=2048, act_dtype=None, mxu_dtype=jnp.bfloat16):
    """x: [B, 2] float32 -> [B, 1] float32 == sigmoid(fc3(relu(fc2(relu(fc1(x))))))."""
    w1, b1, w2, b2, w3, b3 = params                   # PyTorch layouts: [out,in], bias [out]
    B = x.shape[0]
    if act_dtype is None:
        act_dtype = _pick_act_dtype()

    # Batch tile: lane axis -> multiple of 128.  Aim for >= 2 tiles (megacore balance
    # on v7x), cap by block_rows (~0.35 us per grid step amortized by big tiles).
    tb = _round_up(max((B + 1) // 2, 1), 128)
    tb = max(128, min(tb, _round_up(block_rows, 128)))
    num_tiles = pl.cdiv(B, tb)
    b_pad = num_tiles * tb

    # [features, batch] layout: lane-dense input/activations/output.
    if b_pad != B:
        x = jnp.pad(x, ((0, b_pad - B), (0, 0)))
    xT = x.T.astype(act_dtype)                        # [2, b_pad]

    # Cast/reshape params once in the wrapper; constant index_maps keep them
    # VMEM-resident across all grid steps.
    w1k = w1.astype(act_dtype)                        # [256, 2]
    b1k = b1.reshape(D_H1, 1).astype(act_dtype)       # [256, 1]
    w2k = w2.astype(mxu_dtype)                        # [128, 256]
    b2k = b2.reshape(D_H2, 1).astype(jnp.float32)     # [128, 1]
    w3k = w3.astype(mxu_dtype)                        # [1, 128]
    b3k = b3.reshape(1, 1).astype(jnp.float32)        # [1, 1]

    out = pl.pallas_call(
        _mlp_kernel,
        out_shape=jax.ShapeDtypeStruct((1, b_pad), jnp.float32),
        grid=(num_tiles,),
        in_specs=[
            pl.BlockSpec((D_IN, tb), lambda i: (0, i)),      # x: blocked over batch (lanes)
            pl.BlockSpec((D_H1, D_IN), lambda i: (0, 0)),    # weights/biases: resident
            pl.BlockSpec((D_H1, 1), lambda i: (0, 0)),
            pl.BlockSpec((D_H2, D_H1), lambda i: (0, 0)),
            pl.BlockSpec((D_H2, 1), lambda i: (0, 0)),
            pl.BlockSpec((D_OUT, D_H2), lambda i: (0, 0)),
            pl.BlockSpec((1, 1), lambda i: (0, 0)),
        ],
        out_specs=pl.BlockSpec((1, tb), lambda i: (0, i)),   # lane-dense output
        compiler_params=pltpu.CompilerParams(
            dimension_semantics=("parallel",),               # batch tiles -> both TCs on v7x
        ),
    )(xT, w1k, b1k, w2k, b2k, w3k, b3k)

    return out[0, :B].reshape(B, 1)


def init_params(key):
    """PyTorch nn.Linear default init U(-1/sqrt(fan_in), 1/sqrt(fan_in)); [out, in] layout."""
    def linear(key, fan_in, fan_out):
        kw, kb = jax.random.split(key)
        bound = 1.0 / float(fan_in) ** 0.5
        w = jax.random.uniform(kw, (fan_out, fan_in), jnp.float32, -bound, bound)
        b = jax.random.uniform(kb, (fan_out,), jnp.float32, -bound, bound)
        return w, b

    k1, k2, k3 = jax.random.split(key, 3)
    w1, b1 = linear(k1, D_IN, D_H1)
    w2, b2 = linear(k2, D_H1, D_H2)
    w3, b3 = linear(k3, D_H2, D_OUT)
    return (w1, b1, w2, b2, w3, b3)


def reference_forward(x, params):
    """Pure-JAX f32 reference matching the PyTorch module."""
    w1, b1, w2, b2, w3, b3 = params
    h1 = jax.nn.relu(x @ w1.T + b1)
    h2 = jax.nn.relu(h1 @ w2.T + b2)
    return jax.nn.sigmoid(h2 @ w3.T + b3)


def reference_forward_matched(x, params, act_dtype, mxu_dtype):
    """Reference emulating the kernel's dtype choices (bf16 fc2/fc3, act_dtype fc1)."""
    w1, b1, w2, b2, w3, b3 = params
    xA = x.astype(act_dtype)
    w1A = w1.astype(act_dtype)
    b1A = b1.astype(act_dtype)
    h1 = xA[:, 0:1] * w1A[:, 0][None, :] + xA[:, 1:2] * w1A[:, 1][None, :] + b1A[None, :]
    h1 = jnp.maximum(h1, 0.0)
    h2 = jnp.dot(h1.astype(mxu_dtype), w2.astype(mxu_dtype).T,
                 preferred_element_type=jnp.float32) + b2
    h2 = jnp.maximum(h2, 0.0)
    z = jnp.dot(h2.astype(mxu_dtype), w3.astype(mxu_dtype).T,
                preferred_element_type=jnp.float32) + b3
    return jax.nn.sigmoid(z)


if __name__ == "__main__":
    key = jax.random.PRNGKey(0)
    kp, kx = jax.random.split(key)

    params = init_params(kp)
    B = 300                                   # exercises 2 tiles (megacore split) + padding
    x = jax.random.normal(kx, (B, D_IN), dtype=jnp.float32)

    act_dtype = _pick_act_dtype()
    out = dbn_like_forward(x, params, act_dtype=act_dtype)
    out = jax.block_until_ready(out)
    assert out.shape == (B, 1), out.shape

    # Matched-precision check (reference emulates the kernel's dtype choices).
    ref_matched = reference_forward_matched(x, params, act_dtype, jnp.bfloat16)
    err_m = float(jnp.max(jnp.abs(out - ref_matched)))
    assert err_m < 5e-3, err_m

    # Module-semantics check against the full-f32 reference (bounded bf16 drift).
    ref_f32 = reference_forward(x, params)
    err_f = float(jnp.max(jnp.abs(out - ref_f32)))
    assert err_f < 2e-2, err_f

    assert bool(jnp.all((out > 0.0) & (out < 1.0)))
    print("KERNEL_OK")
</pallas_src>

<mosaic_0001>
module attributes {stable_mosaic.version = 11 : i64} {
  func.func @_mlp_kernel(%arg0: i32, %arg1: memref<2x256xf32, #tpu.memory_space<vmem>>, %arg2: memref<256x2xf32, #tpu.memory_space<vmem>>, %arg3: memref<256x1xf32, #tpu.memory_space<vmem>>, %arg4: memref<128x256xbf16, #tpu.memory_space<vmem>>, %arg5: memref<128x1xf32, #tpu.memory_space<vmem>>, %arg6: memref<1x128xbf16, #tpu.memory_space<vmem>>, %arg7: memref<1x1xf32, #tpu.memory_space<vmem>>, %arg8: memref<1x256xf32, #tpu.memory_space<vmem>>) attributes {dimension_semantics = [#tpu.dimension_semantics<parallel>], iteration_bounds = array<i64: 2>, scalar_prefetch = 0 : i64, scratch_operands = 0 : i64, tpu.core_type = #tpu.core_type<tc>, window_params = [{transform_indices = @transform_0, window_bounds = array<i64: 2, 256>}, {pipeline_mode = #tpu.pipeline_mode<synchronous>, transform_indices = @transform_1, window_bounds = array<i64: 256, 2>}, {pipeline_mode = #tpu.pipeline_mode<synchronous>, transform_indices = @transform_2, window_bounds = array<i64: 256, 1>}, {pipeline_mode = #tpu.pipeline_mode<synchronous>, transform_indices = @transform_3, window_bounds = array<i64: 128, 256>}, {pipeline_mode = #tpu.pipeline_mode<synchronous>, transform_indices = @transform_4, window_bounds = array<i64: 128, 1>}, {pipeline_mode = #tpu.pipeline_mode<synchronous>, transform_indices = @transform_5, window_bounds = array<i64: 1, 128>}, {pipeline_mode = #tpu.pipeline_mode<synchronous>, transform_indices = @transform_6, window_bounds = array<i64: 1, 1>}, {transform_indices = @transform_7, window_bounds = array<i64: 1, 256>}]} {
    %c0 = arith.constant 0 : index
    %c0_0 = arith.constant 0 : index
    %0 = vector.load %arg1[%c0, %c0_0] : memref<2x256xf32, #tpu.memory_space<vmem>>, vector<2x256xf32>
    %c0_1 = arith.constant 0 : index
    %c0_2 = arith.constant 0 : index
    %1 = vector.load %arg2[%c0_1, %c0_2] : memref<256x2xf32, #tpu.memory_space<vmem>>, vector<256x2xf32>
    %2 = vector.extract_strided_slice %1 {offsets = [0, 0], sizes = [256, 1], strides = [1, 1]} : vector<256x2xf32> to vector<256x1xf32>
    %3 = vector.extract_strided_slice %0 {offsets = [0, 0], sizes = [1, 256], strides = [1, 1]} : vector<2x256xf32> to vector<1x256xf32>
    %4 = vector.broadcast %2 : vector<256x1xf32> to vector<256x256xf32>
    %5 = vector.broadcast %3 : vector<1x256xf32> to vector<256x256xf32>
    %6 = arith.mulf %4, %5 : vector<256x256xf32>
    %7 = vector.extract_strided_slice %1 {offsets = [0, 1], sizes = [256, 1], strides = [1, 1]} : vector<256x2xf32> to vector<256x1xf32>
    %8 = vector.extract_strided_slice %0 {offsets = [1, 0], sizes = [1, 256], strides = [1, 1]} : vector<2x256xf32> to vector<1x256xf32>
    %9 = vector.broadcast %7 : vector<256x1xf32> to vector<256x256xf32>
    %10 = vector.broadcast %8 : vector<1x256xf32> to vector<256x256xf32>
    %11 = arith.mulf %9, %10 : vector<256x256xf32>
    %12 = arith.addf %6, %11 : vector<256x256xf32>
    %c0_3 = arith.constant 0 : index
    %c0_4 = arith.constant 0 : index
    %13 = vector.load %arg3[%c0_3, %c0_4] : memref<256x1xf32, #tpu.memory_space<vmem>>, vector<256x1xf32>
    %14 = vector.broadcast %13 : vector<256x1xf32> to vector<256x256xf32>
    %15 = arith.addf %12, %14 : vector<256x256xf32>
    %cst = arith.constant 0.000000e+00 : f32
    %16 = vector.broadcast %cst : f32 to vector<256x256xf32>
    %17 = arith.maximumf %15, %16 : vector<256x256xf32>
    %c0_5 = arith.constant 0 : index
    %c0_6 = arith.constant 0 : index
    %18 = vector.load %arg4[%c0_5, %c0_6] : memref<128x256xbf16, #tpu.memory_space<vmem>>, vector<128x256xbf16>
    %19 = arith.truncf %17 : vector<256x256xf32> to vector<256x256xbf16>
    %cst_7 = arith.constant dense<0.000000e+00> : vector<128x256xf32>
    %20 = tpu.matmul %18, %19, %cst_7 {dimension_numbers = #tpu.dot_dimension_numbers<[1], [0], [0], [1], [0, 0, 1, 1], [], []>} : vector<128x256xbf16>, vector<256x256xbf16>, vector<128x256xf32> -> vector<128x256xf32>
    %c0_8 = arith.constant 0 : index
    %c0_9 = arith.constant 0 : index
    %21 = vector.load %arg5[%c0_8, %c0_9] : memref<128x1xf32, #tpu.memory_space<vmem>>, vector<128x1xf32>
    %22 = vector.broadcast %21 : vector<128x1xf32> to vector<128x256xf32>
    %23 = arith.addf %20, %22 : vector<128x256xf32>
    %cst_10 = arith.constant 0.000000e+00 : f32
    %24 = vector.broadcast %cst_10 : f32 to vector<128x256xf32>
    %25 = arith.maximumf %23, %24 : vector<128x256xf32>
    %c0_11 = arith.constant 0 : index
    %c0_12 = arith.constant 0 : index
    %26 = vector.load %arg6[%c0_11, %c0_12] : memref<1x128xbf16, #tpu.memory_space<vmem>>, vector<1x128xbf16>
    %27 = arith.truncf %25 : vector<128x256xf32> to vector<128x256xbf16>
    %cst_13 = arith.constant dense<0.000000e+00> : vector<1x256xf32>
    %28 = tpu.matmul %26, %27, %cst_13 {dimension_numbers = #tpu.dot_dimension_numbers<[1], [0], [0], [1], [0, 0, 1, 1], [], []>} : vector<1x128xbf16>, vector<128x256xbf16>, vector<1x256xf32> -> vector<1x256xf32>
    %c0_14 = arith.constant 0 : index
    %c0_15 = arith.constant 0 : index
    %29 = vector.load %arg7[%c0_14, %c0_15] : memref<1x1xf32, #tpu.memory_space<vmem>>, vector<1x1xf32>
    %30 = vector.broadcast %29 : vector<1x1xf32> to vector<1x256xf32>
    %31 = arith.addf %28, %30 : vector<1x256xf32>
    %cst_16 = arith.constant 0.000000e+00 : f32
    %32 = vector.broadcast %cst_16 : f32 to vector<1x256xf32>
    %33 = arith.subf %32, %31 : vector<1x256xf32>
    %34 = math.exp %33 : vector<1x256xf32>
    %cst_17 = arith.constant 1.000000e+00 : f32
    %35 = vector.broadcast %cst_17 : f32 to vector<1x256xf32>
    %36 = arith.addf %35, %34 : vector<1x256xf32>
    %cst_18 = arith.constant 1.000000e+00 : f32
    %37 = vector.broadcast %cst_18 : f32 to vector<1x256xf32>
    %38 = arith.divf %37, %36 : vector<1x256xf32>
    %c0_19 = arith.constant 0 : index
    %c0_20 = arith.constant 0 : index
    %39 = vector.load %arg8[%c0_19, %c0_20] : memref<1x256xf32, #tpu.memory_space<vmem>>, vector<1x256xf32>
    tpu.vector_store %arg8[%c0_19, %c0_20], %38 {strides = array<i32>} : memref<1x256xf32, #tpu.memory_space<vmem>>, vector<1x256xf32>,
    return
  }
  func.func @transform_0(%arg0: i32) -> (i32, i32) {
    %c0_i32 = arith.constant 0 : i32
    %c0_i32_0 = arith.constant 0 : i32
    return %c0_i32, %arg0 : i32, i32
  }
  func.func @transform_1(%arg0: i32) -> (i32, i32) {
    %c0_i32 = arith.constant 0 : i32
    %c0_i32_0 = arith.constant 0 : i32
    %c0_i32_1 = arith.constant 0 : i32
    return %c0_i32, %c0_i32_0 : i32, i32
  }
  func.func @transform_2(%arg0: i32) -> (i32, i32) {
    %c0_i32 = arith.constant 0 : i32
    %c0_i32_0 = arith.constant 0 : i32
    %c0_i32_1 = arith.constant 0 : i32
    return %c0_i32, %c0_i32_0 : i32, i32
  }
  func.func @transform_3(%arg0: i32) -> (i32, i32) {
    %c0_i32 = arith.constant 0 : i32
    %c0_i32_0 = arith.constant 0 : i32
    %c0_i32_1 = arith.constant 0 : i32
    return %c0_i32, %c0_i32_0 : i32, i32
  }
  func.func @transform_4(%arg0: i32) -> (i32, i32) {
    %c0_i32 = arith.constant 0 : i32
    %c0_i32_0 = arith.constant 0 : i32
    %c0_i32_1 = arith.constant 0 : i32
    return %c0_i32, %c0_i32_0 : i32, i32
  }
  func.func @transform_5(%arg0: i32) -> (i32, i32) {
    %c0_i32 = arith.constant 0 : i32
    %c0_i32_0 = arith.constant 0 : i32
    %c0_i32_1 = arith.constant 0 : i32
    return %c0_i32, %c0_i32_0 : i32, i32
  }
  func.func @transform_6(%arg0: i32) -> (i32, i32) {
    %c0_i32 = arith.constant 0 : i32
    %c0_i32_0 = arith.constant 0 : i32
    %c0_i32_1 = arith.constant 0 : i32
    return %c0_i32, %c0_i32_0 : i32, i32
  }
  func.func @transform_7(%arg0: i32) -> (i32, i32) {
    %c0_i32 = arith.constant 0 : i32
    %c0_i32_0 = arith.constant 0 : i32
    return %c0_i32, %arg0 : i32, i32
  }
}

</mosaic_0001>

<bundles_post_ra>
// kernel: tpu_custom_call.1
= control target key start
LH: loop header
LB: loop body
LE: loop exit
PB: predicated region body
PF: predicated region fallthrough
CT: control target
= control target key end

     0   :  { %s2715_s0 = inlined_call_operand.vmem [shape: f32[2,512], index: 0, kind: input, shape index: {}]   ;;  %s2716_s1 = inlined_call_operand.vmem [shape: f32[256,2], index: 1, kind: input, shape index: {}]   ;;  %s2717_s2 = inlined_call_operand.vmem [shape: f32[256,1], index: 2, kind: input, shape index: {}]   ;;  %s2718_s3 = inlined_call_operand.vmem [shape: bf16[128,256], index: 3, kind: input, shape index: {}]   ;;  %s2719_s4 = inlined_call_operand.vmem [shape: f32[128,1], index: 4, kind: input, shape index: {}]   ;;  %s2720_s5 = inlined_call_operand.vmem [shape: bf16[1,128], index: 5, kind: input, shape index: {}]   ;;  %s2721_s6 = inlined_call_operand.<no memory space> [shape: f32[1,1], index: 6, kind: input, shape index: {}]   ;;  %s2722_s7 = inlined_call_operand.hbm [shape: f32[1,512], index: 7, kind: output, shape index: {}]  }
   0x1   :  { %v12_v0 = vstv %s2721_s6 }
   0x2   :  { %13 = vst [vmem:[#allocation2] sm:$0x1] %v12_v0 }
   0x3   :  { %14 = vsyncpa [#allocation4], 0 }
   0x4   :  { %16 = vsyncpa [#allocation4 + $0x1], 0  ;;  %s1947_s26 = smov 0   ;;  %s1949_s27 = smov 0  }
   0x5   :  { %s1951_s28 = smov 0   ;;  %s1953_s29 = smov 0  }
   0x6 LB: > { %s1968_s6 = sadd.s32 4294967295, %s1898_s29   ;;  %s1699_s30 = sadd.s32 4294967294, %s1898_s29   ;;  %s1898_s29 = sphi %s1953_s29, %s2757_s29   ;;  %s1894_s28 = sphi %s1951_s28, %s2756_s28   ;;  %s1890_s27 = sphi %s1949_s27, %s2755_s27   ;;  %s1886_s26 = sphi %s1947_s26, %s2754_s26  }
   0x7   : > { %s1972_s8 = sadd.s32 1, %s1898_s29   ;;  %s181_s9 = sadd.s32 1, %s1894_s28 }
   0x8   : > { %s178_s10 = ssub.s32 %s1898_s29, %s1972_s8  ;;  %p191_p0 = scmp.ne.s32.totalorder %s1894_s28, %s1890_s27 }
   0x9   : > { %p179_p1 = scmp.eq.s32.totalorder %s178_s10, 0  ;;  %p192_p2 = scmp.eq.s32.totalorder %s1968_s6, 1 }
   0xa   : > { %p197_p3 = scmp.ne.s32.totalorder %s1890_s27, %s1886_s26  ;;  %p198_p4 = scmp.eq.s32.totalorder %s1699_s30, 1 }
   0xb   : > { %s1983_s11 = scalar_select %p179_p1, %s1894_s28, %s181_s9  }
   0xc   : > { %p1985_p5 = por %p192_p2, %p191_p0  ;;  %p1989_p6 = por %p198_p4, %p197_p3 }
   0xd   : > { %p1702_p7 = scmp.ge.s32.totalorder %s1898_s29, 1  ;;  %p243_p8 = scmp.lt.s32.totalorder %s1898_s29, 3 }
   0xf   : > { %p244_p9 = pnand %p1702_p7, %p243_p8 }
  0x11   : > { %247 = sbr.rel (%p244_p9) target bundleno = 987 (0x3db), region = 48 }
  0x18   : > { %v1998_v1 = vld [vmem:[%s2716_s1 + $0x10] sm:$0xff]  ;;  %v2003_v2 = vld [vmem:[%s2716_s1] sm:$0xff]  ;;  %v2724_v3 = vmov 1   ;;  %v285_v5 = vld [vmem:[%s2716_s1 + $0x8] sm:$0xff]  ;;  %v2731_v6 = vmov 0   ;;  %s1704_s25 = sshll.u32 %s1968_s6, 1 }
  0x19   : > { %1772 = vset.pattern.permute.xlu0 %v2724_v3  ;;  %1770 = vset.pattern.permute.xlu1 %v2724_v3  ;;  %v288_v4 = vld [vmem:[%s2716_s1 + $0x20] sm:$0xff]  ;;  %v290_v7 = vld [vmem:[%s2716_s1 + $0x30] sm:$0xff]  ;;  %v287_v8 = vld [vmem:[%s2716_s1 + $0x18] sm:$0xff]  ;;  %p276_p10 = scmp.lt.s32.totalorder %s1704_s25, 3  ;;  %s272_s18 = sand.u32 1, %s1890_s27  }
  0x1a   : > { %568 = vperm.xlu0 %1772, %v1998_v1   ;;  %560 = vperm.xlu1 %1770, %v2003_v2   ;;  %v292_v9 = vld [vmem:[%s2716_s1 + $0x40] sm:$0xff]  ;;  %v294_v10 = vld [vmem:[%s2716_s1 + $0x50] sm:$0xff]  ;;  %v289_v14 = vld [vmem:[%s2716_s1 + $0x28] sm:$0xff]  ;;  %s1703_s19 = sshll.u32 %s272_s18, 1  ;;  %s1727_s20 = sshll.u32 %s1968_s6, 5 }
  0x1b   : > { %1581 = vmatprep.mubr.bf16.mxu1 %v2731_v6  ;;  %v833_v11 = vld [vmem:[%s2717_s2] sm:$0xff]  ;;  %v2043_v13 = vld [vmem:[%s2716_s1 + $0x70] sm:$0xff]  ;;  %v291_v21 = vld [vmem:[%s2716_s1 + $0x38] sm:$0xff]  ;;  %s2759_s25 = smov (!%p276_p10, %s1704_s25), 3  ;;  %s274_s21 = scalar_lea.vmem [#allocation3], %s1703_s19 }
  0x1c   : > { %v2036_v12 = vld [vmem:[%s2716_s1 + $0x60] sm:$0xff]  ;;  %v2058_v16 = vld [vmem:[%s2716_s1 + $0x90] sm:$0xff]  ;;  %v293_v26 = vld [vmem:[%s2716_s1 + $0x48] sm:$0xff]  ;;  %s1705_s10 = sshll.u32 %s2759_s25, 1  ;;  %s1640_s22 = sshll.u32 %s274_s21, 4  ;;  %s2675_s22 = int_to_ptr.vmem [resolvable:$true] %s1640_s22 }
  0x1d   : > { %v2052_v15 = vld [vmem:[%s2716_s1 + $0x80] sm:$0xff]  ;;  %v835_v18 = vld [vmem:[%s2717_s2 + $0x10] sm:$0xff]  ;;  %v834_v27 = vld [vmem:[%s2717_s2 + $0x8] sm:$0xff]  ;;  %s279_s16 = scalar_lea.vmem %s2715_s0, %s1705_s10  ;;  %s2673_s25 = scalar_lea.hbm %s2722_s7, %s1727_s20 }
  0x1e   : > { %576 = vperm.xlu0 %1772, %v288_v4   ;;  %564 = vperm.xlu1 %1770, %v285_v5   ;;  %v2065_v17 = vld [vmem:[%s2716_s1 + $0xa0] sm:$0xff]  ;;  %v2075_v19 = vld [vmem:[%s2716_s1 + $0xb0] sm:$0xff]  ;;  %v836_v29 = vld [vmem:[%s2717_s2 + $0x18] sm:$0xff]  ;;  %s1626_s30 = scalar_lea.sflag [#allocation4], %s272_s18  ;;  %s1836_s9 = scalar_lea.vmem %s2675_s22, 32 }
  0x1f   : > { %v2081_v20 = vld [vmem:[%s2716_s1 + $0xc0] sm:$0xff]  ;;  %v2090_v22 = vld [vmem:[%s2716_s1 + $0xd0] sm:$0xff]  ;;  %v838_v30 = vld [vmem:[%s2717_s2 + $0x28] sm:$0xff]  ;;  %p1837_p11 = scmp.ne.s32.totalorder %s2675_s22, %s1836_s9  ;;  %s1903_s6 = smov [#allocation3]  }
  0x20   : > { %v2097_v23 = vld [vmem:[%s2716_s1 + $0xe0] sm:$0xff]  ;;  %v2106_v25 = vld [vmem:[%s2716_s1 + $0xf0] sm:$0xff]  ;;  %v295_v31 = vld [vmem:[%s2716_s1 + $0x58] sm:$0xff]  ;;  %s1840_s10 = sshll.u32 %s1903_s6, 4  ;;  %s1841_s10 = int_to_ptr.vmem [resolvable:$false] %s1840_s10 }
  0x21   : > { %v837_v24 = vld [vmem:[%s2717_s2 + $0x20] sm:$0xff]  ;;  %v839_v28 = vld [vmem:[%s2717_s2 + $0x30] sm:$0xff]  ;;  %v840_v32 = vld [vmem:[%s2717_s2 + $0x38] sm:$0xff]  ;;  %p1838_p12 = pnand %p1837_p11, %p1985_p5  ;;  %s1842_s14 = scalar_lea.vmem %s1841_s10, 64 }
  0x22   : > { %584 = vperm.xlu0 %1772, %v290_v7   ;;  %1771 = vset.pattern.permute.xlu1 %v2731_v6  ;;  %v842_v33 = vld [vmem:[%s2717_s2 + $0x48] sm:$0xff]  ;;  %v841_v34 = vld [vmem:[%s2717_s2 + $0x40] sm:$0xff]  ;;  %v844_v35 = vld [vmem:[%s2717_s2 + $0x58] sm:$0xff]  ;;  %p1843_p0 = scmp.lt.s32.totalorder %s2675_s22, %s1841_s10  ;;  %p1844_p1 = scmp.lt.s32.totalorder %s1842_s14, %s1836_s9 }
  0x23   : > { %333 = vperm.xlu1 %1771, %v287_v8   ;;  %v846_v36 = vld [vmem:[%s2717_s2 + $0x68] sm:$0xff]  ;;  %v848_v38 = vld [vmem:[%s2717_s2 + $0x78] sm:$0xff]  ;;  %v843_v40 = vld [vmem:[%s2717_s2 + $0x50] sm:$0xff]  ;;  %p1839_p13 = pneg %p1838_p12 }
  0x24   : > { %v297_v37 = vld [vmem:[%s2716_s1 + $0x68] sm:$0xff]  ;;  %v852_v41 = vld [vmem:[%s2717_s2 + $0x98] sm:$0xff]  ;;  %v845_v47 = vld [vmem:[%s2717_s2 + $0x60] sm:$0xff]  ;;  %p1845_p2 = por %p1844_p1, %p1843_p0 }
  0x25   : > { %v850_v39 = vld [vmem:[%s2717_s2 + $0x88] sm:$0xff]  ;;  %v299_v43 = vld [vmem:[%s2716_s1 + $0x78] sm:$0xff]  ;;  %v1201_v51 = vld [vmem:[%s2719_s4] sm:$0xff] }
  0x26   : > { %592 = vperm.xlu0 %1772, %v292_v9   ;;  %v854_v42 = vld [vmem:[%s2717_s2 + $0xa8] sm:$0xff]  ;;  %v856_v44 = vld [vmem:[%s2717_s2 + $0xb8] sm:$0xff]  ;;  %v1203_v55 = vld [vmem:[%s2719_s4 + $0x10] sm:$0xff]  ;;  %p1846_p3 = pnand %p1845_p2, %p1839_p13 }
  0x27   : > { %1773 = vset.pattern.permute.xlu1 %v2724_v3  ;;  %v858_v45 = vld [vmem:[%s2717_s2 + $0xc8] sm:$0xff]  ;;  %v860_v46 = vld [vmem:[%s2717_s2 + $0xd8] sm:$0xff]  ;;  %v1205_v58 = vld [vmem:[%s2719_s4 + $0x20] sm:$0xff] }
  0x28   : > { %572 = vperm.xlu1 %1773, %v287_v8   ;;  %v862_v48 = vld [vmem:[%s2717_s2 + $0xe8] sm:$0xff]  ;;  %v847_v61 = vld [vmem:[%s2717_s2 + $0x70] sm:$0xff] }
  0x29   : > { %v301_v54 = vld [vmem:[%s2716_s1 + $0x88] sm:$0xff]  ;;  %v1207_v62 = vld [vmem:[%s2719_s4 + $0x30] sm:$0xff] }
  0x2a   : > { %600 = vperm.xlu0 %1772, %v294_v10  }
  0x2c   : > { %1774 = vset.pattern.permute.xlu1 %v2731_v6 }
  0x2d   : > { %867 = vperm.xlu1 %1774, %v833_v11  }
  0x2e   : > { %608 = vperm.xlu0 %1772, %v2036_v12  }
  0x31   : > { %338 = vperm.xlu1 %1774, %v288_v4  }
  0x32   : > { %616 = vperm.xlu0 %1772, %v2043_v13  }
  0x35   : > { %343 = vperm.xlu1 %1774, %v289_v14  }
  0x36   : > { %624 = vperm.xlu0 %1772, %v2052_v15  }
  0x39   : > { %1775 = vset.pattern.permute.xlu1 %v2724_v3 }
  0x3a   : > { %632 = vperm.xlu0 %1772, %v2058_v16   ;;  %580 = vperm.xlu1 %1775, %v289_v14  }
  0x3e   : > { %640 = vperm.xlu0 %1772, %v2065_v17   ;;  %1776 = vset.pattern.permute.xlu1 %v2731_v6 }
  0x3f   : > { %877 = vperm.xlu1 %1776, %v835_v18  }
  0x42   : > { %648 = vperm.xlu0 %1772, %v2075_v19  }
  0x43   : > { %348 = vperm.xlu1 %1776, %v290_v7   ;;  %v1211_v7 = vld [vmem:[%s2719_s4 + $0x50] sm:$0xff] }
  0x46   : > { %656 = vperm.xlu0 %1772, %v2081_v20  }
  0x47   : > { %353 = vperm.xlu1 %1776, %v291_v21  }
  0x4a   : > { %664 = vperm.xlu0 %1772, %v2090_v22  }
  0x4b   : > { %1777 = vset.pattern.permute.xlu1 %v2724_v3 }
  0x4c   : > { %588 = vperm.xlu1 %1777, %v291_v21  }
  0x4e   : > { %672 = vperm.xlu0 %1772, %v2097_v23  }
  0x50   : > { %1778 = vset.pattern.permute.xlu1 %v2731_v6 }
  0x51   : > { %887 = vperm.xlu1 %1778, %v837_v24  }
  0x52   : > { %680 = vperm.xlu0 %1772, %v2106_v25  }
  0x55   : > { %358 = vperm.xlu1 %1778, %v292_v9  }
  0x56   : > { %1801 = vset.pattern.permute.xlu0 %v2731_v6 }
  0x57   : > { %318 = vperm.xlu0 %1801, %v2003_v2  }
  0x59   : > { %363 = vperm.xlu1 %1778, %v293_v26  }
  0x5b   : > { %323 = vperm.xlu0 %1801, %v285_v5   ;;  %v303_v5 = vld [vmem:[%s2716_s1 + $0x98] sm:$0xff] }
  0x5d   : > { %1779 = vset.pattern.permute.xlu1 %v2724_v3 }
  0x5e   : > { %596 = vperm.xlu1 %1779, %v293_v26  }
  0x5f   : > { %328 = vperm.xlu0 %1801, %v1998_v1   ;;  %v1209_v1 = vld [vmem:[%s2719_s4 + $0x40] sm:$0xff] }
  0x62   : > { %1780 = vset.pattern.permute.xlu1 %v2731_v6 }
  0x63   : > { %872 = vperm.xlu0 %1801, %v834_v27   ;;  %897 = vperm.xlu1 %1780, %v839_v28   ;;  %v305_v27 = vld [vmem:[%s2716_s1 + $0xa8] sm:$0xff]  ;;  %v2723_v28 = vlaneseq }
  0x67   : > { %882 = vperm.xlu0 %1801, %v836_v29   ;;  %368 = vperm.xlu1 %1780, %v294_v10   ;;  %v1213_v10 = vld [vmem:[%s2719_s4 + $0x60] sm:$0xff] }
  0x6b   : > { %892 = vperm.xlu0 %1801, %v838_v30   ;;  %373 = vperm.xlu1 %1780, %v295_v31  }
  0x6f   : > { %902 = vperm.xlu0 %1801, %v840_v32   ;;  %1781 = vset.pattern.permute.xlu1 %v2724_v3 }
  0x70   : > { %604 = vperm.xlu1 %1781, %v295_v31   ;;  %v2286_v31 = vshrl.u32 %v2723_v28, 7 }
  0x72   : > { %2739 = vst [vmem:[#allocation8_spill] sm:$0xff] %v2286_v31 }
  0x73   : > { %912 = vperm.xlu0 %1801, %v842_v33   ;;  %v851_v33 = vld [vmem:[%s2717_s2 + $0x90] sm:$0xff] }
  0x74   : > { %1782 = vset.pattern.permute.xlu1 %v2731_v6 }
  0x75   : > { %907 = vperm.xlu1 %1782, %v841_v34   ;;  %v689_v34 = vsub.s32 1, %v2286_v31 }
  0x77   : > { %922 = vperm.xlu0 %1801, %v844_v35  }
  0x79   : > { %378 = vperm.xlu1 %1782, %v2036_v12   ;;  %v1215_v12 = vld [vmem:[%s2719_s4 + $0x70] sm:$0xff] }
  0x7b   : > { %932 = vperm.xlu0 %1801, %v846_v36   ;;  %v693_v36 = vsub.s32 3, %v2286_v31 }
  0x7d   : > { %383 = vperm.xlu1 %1782, %v297_v37  }
  0x7f   : > { %942 = vperm.xlu0 %1801, %v848_v38   ;;  %v2305_v38 = vsub.s32 0, %v2286_v31 }
  0x81   : > { %1783 = vset.pattern.permute.xlu1 %v2724_v3  ;;  %2742 = vst [vmem:[#allocation11_spill] sm:$0xff] %v2305_v38 }
  0x82   : > { %612 = vperm.xlu1 %1783, %v297_v37   ;;  %v283_v37 = vld [vmem:[%s279_s16] sm:$0xf] }
  0x83   : > { %952 = vperm.xlu0 %1801, %v850_v39   ;;  %v483_v39 = vsub.s32 2, %v2286_v31 }
  0x86   : > { %1784 = vset.pattern.permute.xlu1 %v2731_v6 }
  0x87   : > { %917 = vperm.xlu1 %1784, %v843_v40   ;;  %962 = vperm.xlu0 %1801, %v852_v41   ;;  %v690_v41 = vrot.slane %v283_v37, %v689_v34 }
  0x8b   : > { %388 = vperm.xlu1 %1784, %v2043_v13   ;;  %972 = vperm.xlu0 %1801, %v854_v42  }
  0x8f   : > { %393 = vperm.xlu1 %1784, %v299_v43   ;;  %982 = vperm.xlu0 %1801, %v856_v44   ;;  %v480_v44 = vrot.slane %v283_v37, %v2305_v38 }
  0x93   : > { %1785 = vset.pattern.permute.xlu1 %v2724_v3  ;;  %992 = vperm.xlu0 %1801, %v858_v45   ;;  %v484_v45 = vrot.slane %v283_v37, %v483_v39 }
  0x94   : > { %620 = vperm.xlu1 %1785, %v299_v43   ;;  %v694_v43 = vrot.slane %v283_v37, %v693_v36 }
  0x97   : > { %1002 = vperm.xlu0 %1801, %v860_v46  }
  0x98   : > { %1786 = vset.pattern.permute.xlu1 %v2731_v6 }
  0x99   : > { %927 = vperm.xlu1 %1786, %v845_v47   ;;  %v2192_v49 = vpop.permute.xlu1 %560  ;;  %v2194_v50 = vpop.permute.xlu0 %568  ;;  %v307_v47 = vld [vmem:[%s2716_s1 + $0xb8] sm:$0xff] }
  0x9b   : > { %1012 = vperm.xlu0 %1801, %v862_v48   ;;  %v2319_v48 = vrot.slane %v690_v41, %v689_v34 }
  0x9d   : > { %398 = vperm.xlu1 %1786, %v2052_v15   ;;  %v2200_v52 = vpop.permute.xlu1 %564  ;;  %v2202_v53 = vpop.permute.xlu0 %576  ;;  %v849_v15 = vld [vmem:[%s2717_s2 + $0x80] sm:$0xff] }
  0x9f   : > { %1219 = vperm.xlu0 %1801, %v1201_v51   ;;  %v2321_v51 = vrot.slane %v694_v43, %v689_v34 }
  0xa1   : > { %403 = vperm.xlu1 %1786, %v301_v54   ;;  %v2210_v56 = vpop.permute.xlu0 %584 }
  0xa2   : > { %v2212_v57 = vpop.permute.xlu1 %333 }
  0xa3   : > { %1229 = vperm.xlu0 %1801, %v1203_v55   ;;  %v2324_v55 = vrot.slane %v480_v44, %v2305_v38 }
  0xa5   : > { %1787 = vset.pattern.permute.xlu1 %v2724_v3  ;;  %v2218_v59 = vpop.permute.xlu0 %592 }
  0xa6   : > { %628 = vperm.xlu1 %1787, %v301_v54   ;;  %v2374_v41 = vmul.f32 %v2321_v51, %v2218_v59 }
  0xa7   : > { %v2220_v60 = vpop.permute.xlu1 %572  ;;  %1239 = vperm.xlu0 %1801, %v1205_v58  }
  0xa8   : > { %v711_v34 = vmul.f32 %v2319_v48, %v2220_v60 }
  0xa9   : > { %v2228_v63 = vpop.permute.xlu0 %600 }
  0xaa   : > { %1788 = vset.pattern.permute.xlu1 %v2731_v6 }
  0xab   : > { %937 = vperm.xlu1 %1788, %v847_v61   ;;  %1249 = vperm.xlu0 %1801, %v1207_v62   ;;  %v705_v61 = vmul.f32 %v2319_v48, %v2192_v49  ;;  %v706_v62 = vmul.f32 %v2321_v51, %v2192_v49  ;;  %v713_v49 = vmul.f32 %v2319_v48, %v2202_v53 }
  0xac   : > { %v2231_v0 = vpop.permute.xlu1 %867 }
  0xad   : > { %v2236_v2 = vpop.permute.xlu0 %608 }
  0xaf   : > { %408 = vperm.xlu1 %1788, %v2058_v16   ;;  %1259 = vperm.xlu0 %1801, %v1209_v1   ;;  %v1539_v16 = vld [vmem:[#allocation2] sm:$0x1]  ;;  %v709_v1 = vmul.f32 %v2319_v48, %v2194_v50 }
  0xb0   : > { %v2239_v4 = vpop.permute.xlu1 %338 }
  0xb1   : > { %v2247_v8 = vpop.permute.xlu0 %616 }
  0xb3   : > { %413 = vperm.xlu1 %1788, %v303_v5   ;;  %1269 = vperm.xlu0 %1801, %v1211_v7  }
  0xb4   : > { %v2249_v9 = vpop.permute.xlu1 %343 }
  0xb5   : > { %v2254_v11 = vpop.permute.xlu0 %624 }
  0xb7   : > { %1789 = vset.pattern.permute.xlu1 %v2724_v3  ;;  %1279 = vperm.xlu0 %1801, %v1213_v10  }
  0xb8   : > { %636 = vperm.xlu1 %1789, %v303_v5  }
  0xb9   : > { %v2260_v13 = vpop.permute.xlu1 %580  ;;  %v2262_v14 = vpop.permute.xlu0 %632 }
  0xbb   : > { %1289 = vperm.xlu0 %1801, %v1215_v12   ;;  %v710_v12 = vmul.f32 %v2321_v51, %v2194_v50  ;;  %v2356_v50 = vmul.f32 %v2321_v51, %v2210_v56 }
  0xbc   : > { %1790 = vset.pattern.permute.xlu1 %v2731_v6 }
  0xbd   : > { %947 = vperm.xlu1 %1790, %v849_v15   ;;  %v2269_v18 = vpop.permute.xlu0 %640  ;;  %v707_v15 = vmul.f32 %v2319_v48, %v2200_v52 }
  0xbe   : > { %v2271_v21 = vpop.permute.xlu1 %877 }
  0xbf   : > { %1542 = vperm.xlu0 %1801, %v1539_v16   ;;  %v708_v16 = vmul.f32 %v2321_v51, %v2200_v52  ;;  %v501_v52 = vmul.f32 %v2324_v55, %v2212_v57 }
  0xc1   : > { %418 = vperm.xlu1 %1790, %v2065_v17   ;;  %v2274_v24 = vpop.permute.xlu0 %648 }
  0xc2   : > { %2737 = vst [vmem:[#allocation6_spill] sm:$0xff] %v2274_v24  ;;  %v2276_v26 = vpop.permute.xlu1 %348 }
  0xc5   : > { %423 = vperm.xlu1 %1790, %v305_v27   ;;  %v2281_v29 = vpop.permute.xlu0 %656 }
  0xc6   : > { %2738 = vst [vmem:[#allocation7_spill] sm:$0xff] %v2281_v29  ;;  %v2283_v30 = vpop.permute.xlu1 %353  ;;  %v507_v29 = vmul.f32 %v2324_v55, %v2276_v26 }
  0xc9   : > { %1791 = vset.pattern.permute.xlu1 %v2724_v3  ;;  %v2289_v17 = vpop.permute.xlu0 %664 }
  0xca   : > { %2740 = vst [vmem:[#allocation9_spill] sm:$0xff] %v2289_v17  ;;  %644 = vperm.xlu1 %1791, %v305_v27   ;;  %v714_v27 = vmul.f32 %v2321_v51, %v2202_v53 }
  0xcb   : > { %v2294_v32 = vpop.permute.xlu1 %588 }
  0xcd   : > { %v2300_v35 = vpop.permute.xlu0 %672 }
  0xce   : > { %2741 = vst [vmem:[#allocation10_spill] sm:$0xff] %v2300_v35  ;;  %1792 = vset.pattern.permute.xlu1 %v2731_v6 }
  0xcf   : > { %957 = vperm.xlu1 %1792, %v851_v33   ;;  %v2352_v33 = vmul.f32 %v2319_v48, %v2210_v56  ;;  %v2370_v56 = vmul.f32 %v2319_v48, %v2218_v59 }
  0xd0   : > { %v2308_v40 = vpop.permute.xlu1 %887 }
  0xd1   : > { %v2310_v42 = vpop.permute.xlu0 %680 }
  0xd2   : > { %2743 = vst [vmem:[#allocation12_spill] sm:$0xff] %v2310_v42 }
  0xd3   : > { %428 = vperm.xlu1 %1792, %v2075_v19   ;;  %v2327_v19 = vrot.slane %v484_v45, %v2305_v38 }
  0xd4   : > { %v2314_v46 = vpop.permute.xlu1 %358 }
  0xd5   : > { %v502_v36 = vmul.f32 %v2327_v19, %v2212_v57  ;;  %v853_v57 = vld [vmem:[%s2717_s2 + $0xa0] sm:$0xff]  ;;  %v504_v59 = vmul.f32 %v2327_v19, %v2239_v4 }
  0xd6   : > { %v319_v54 = vpop.permute.xlu0 %318 }
  0xd7   : > { %433 = vperm.xlu1 %1792, %v307_v47   ;;  %v495_v5 = vmul.f32 %v2324_v55, %v319_v54  ;;  %v496_v7 = vmul.f32 %v2327_v19, %v319_v54  ;;  %v503_v54 = vmul.f32 %v2324_v55, %v2239_v4  ;;  %v778_v24 = vadd.f32 %v714_v27, %v504_v59 }
  0xd8   : > { %v2329_v58 = vpop.permute.xlu1 %363 }
  0xd9   : > { %v769_v43 = vadd.f32 %v705_v61, %v495_v5  ;;  %v770_v44 = vadd.f32 %v706_v62, %v496_v7  ;;  %v715_v61 = vmul.f32 %v2319_v48, %v2260_v13  ;;  %v716_v62 = vmul.f32 %v2321_v51, %v2260_v13 }
  0xda   : > { %v324_v10 = vpop.permute.xlu0 %323  ;;  %v775_v5 = vadd.f32 %v711_v34, %v501_v52  ;;  %v506_v7 = vmul.f32 %v2327_v19, %v2249_v9  ;;  %v777_v17 = vadd.f32 %v713_v49, %v503_v54  ;;  %v309_v49 = vld [vmem:[%s2716_s1 + $0xc8] sm:$0xff] }
  0xdb   : > { %1793 = vset.pattern.permute.xlu1 %v2724_v3  ;;  %v497_v53 = vmul.f32 %v2324_v55, %v324_v10  ;;  %v498_v37 = vmul.f32 %v2327_v19, %v324_v10  ;;  %v1026_v35 = vadd.f32 %v2231_v0, %v770_v44  ;;  %v1025_v13 = vadd.f32 %v2231_v0, %v769_v43 }
  0xdc   : > { %652 = vperm.xlu1 %1793, %v307_v47   ;;  %v712_v47 = vmul.f32 %v2321_v51, %v2220_v60  ;;  %v505_v60 = vmul.f32 %v2324_v55, %v2249_v9  ;;  %v510_v44 = vmul.f32 %v2327_v19, %v2283_v30 }
  0xdd   : > { %v2366_v39 = vpop.permute.xlu1 %596  ;;  %v772_v3 = vadd.f32 %v708_v16, %v498_v37  ;;  %v1090_v27 = vmax.f32 %v1026_v35, 0.0  ;;  %v781_v35 = vadd.f32 %v2352_v33, %v507_v29  ;;  %v511_v29 = vmul.f32 %v2324_v55, %v2314_v46 }
  0xde   : > { %v329_v45 = vpop.permute.xlu0 %328  ;;  %v776_v52 = vadd.f32 %v712_v47, %v502_v36  ;;  %v779_v9 = vadd.f32 %v715_v61, %v505_v60  ;;  %v720_v36 = vmul.f32 %v2321_v51, %v2294_v32 }
  0xdf   : > { %v499_v10 = vmul.f32 %v2324_v55, %v329_v45  ;;  %v500_v28 = vmul.f32 %v2327_v19, %v329_v45  ;;  %v771_v45 = vadd.f32 %v707_v15, %v497_v53 }
  0xe0   : > { %1794 = vset.pattern.permute.xlu1 %v2731_v6  ;;  %v784_v60 = vadd.f32 %v720_v36, %v510_v44 }
  0xe1   : > { %967 = vperm.xlu1 %1794, %v853_v57   ;;  %v773_v31 = vadd.f32 %v709_v1, %v499_v10  ;;  %v774_v4 = vadd.f32 %v710_v12, %v500_v28  ;;  %v780_v57 = vadd.f32 %v716_v62, %v506_v7  ;;  %v508_v1 = vmul.f32 %v2327_v19, %v2276_v26 }
  0xe2   : > { %v873_v38 = vpop.permute.xlu0 %872  ;;  %v898_v42 = vpop.permute.xlu1 %897  ;;  %v719_v28 = vmul.f32 %v2319_v48, %v2294_v32  ;;  %v1089_v26 = vmax.f32 %v1025_v13, 0.0 }
  0xe3   : > { %v1027_v6 = vadd.f32 %v873_v38, %v771_v45  ;;  %v1028_v34 = vadd.f32 %v873_v38, %v772_v3  ;;  %v1029_v15 = vadd.f32 %v2271_v21, %v773_v31  ;;  %v1030_v3 = vadd.f32 %v2271_v21, %v774_v4 }
  0xe4   : > { %v509_v31 = vmul.f32 %v2324_v55, %v2283_v30  ;;  %v1034_v21 = vadd.f32 %v2308_v40, %v778_v24  ;;  %v782_v32 = vadd.f32 %v2356_v50, %v508_v1  ;;  %v512_v50 = vmul.f32 %v2327_v19, %v2314_v46 }
  0xe5   : > { %v1091_v12 = vmax.f32 %v1027_v6, 0.0  ;;  %438 = vperm.xlu1 %1794, %v2081_v20   ;;  %v1092_v0 = vmax.f32 %v1028_v34, 0.0  ;;  %v1033_v6 = vadd.f32 %v2308_v40, %v777_v17  ;;  %v1094_v59 = vmax.f32 %v1030_v3, 0.0 }
  0xe6   : > { %v883_v38 = vpop.permute.xlu0 %882  ;;  %v2407_v16 = vpop.permute.xlu1 %368  ;;  %v783_v61 = vadd.f32 %v719_v28, %v509_v31  ;;  %v1093_v62 = vmax.f32 %v1029_v15, 0.0  ;;  %v1098_v30 = vmax.f32 %v1034_v21, 0.0  ;;  %v1038_v45 = vadd.f32 %v898_v42, %v782_v32 }
  0xe7   : > { %v1031_v20 = vadd.f32 %v883_v38, %v775_v5  ;;  %v1032_v53 = vadd.f32 %v883_v38, %v776_v52  ;;  %v1170_v37 = vpack.c.bf16 %v1092_v0, %v1090_v27  ;;  %v1169_v43 = vpack.c.bf16 %v1091_v12, %v1089_v26 }
  0xe8   : > { %v1097_v24 = vmax.f32 %v1033_v6, 0.0  ;;  %v2744_v34 = vmov 1   ;;  %v723_v52 = vmul.f32 %v2319_v48, %v2366_v39  ;;  %v513_v3 = vmul.f32 %v2324_v55, %v2329_v58 }
  0xe9   : > { %v1095_v47 = vmax.f32 %v1031_v20, 0.0  ;;  %v1096_v54 = vmax.f32 %v1032_v53, 0.0  ;;  %443 = vperm.xlu1 %1794, %v309_v49   ;;  %1377 = vmatprep.subr.bf16.mxu0 %v1170_v37  ;;  %v514_v38 = vmul.f32 %v2327_v19, %v2329_v58  ;;  %v2745_v53 = vmov 0  }
  0xea   : > { %v893_v17 = vpop.permute.xlu0 %892  ;;  %v2422_v10 = vpop.permute.xlu1 %373  ;;  %1378 = vmatpush1.bf16.msra.mxu0 %v1169_v43  ;;  %v787_v6 = vadd.f32 %v723_v52, %v513_v3  ;;  %v785_v31 = vadd.f32 %v2370_v56, %v511_v29  ;;  %v786_v58 = vadd.f32 %v2374_v41, %v512_v50  ;;  %v311_v56 = vld [vmem:[%s2716_s1 + $0xd8] sm:$0xff]  ;;  %v515_v29 = vmul.f32 %v2324_v55, %v2407_v16 }
  0xeb   : > { %v1035_v40 = vadd.f32 %v893_v17, %v779_v9  ;;  %v1036_v5 = vadd.f32 %v893_v17, %v780_v57  ;;  %v1172_v33 = vpack.c.bf16 %v1096_v54, %v1094_v59  ;;  %v1171_v7 = vpack.c.bf16 %v1095_v47, %v1093_v62 }
  0xec   : > { %v724_v9 = vmul.f32 %v2321_v51, %v2366_v39  ;;  %v1037_v57 = vadd.f32 %v898_v42, %v781_v35  ;;  %v855_v39 = vld [vmem:[%s2717_s2 + $0xb0] sm:$0xff]  ;;  %v1102_v42 = vmax.f32 %v1038_v45, 0.0  ;;  %v518_v50 = vmul.f32 %v2327_v19, %v2422_v10 }
  0xed   : > { %v1099_v4 = vmax.f32 %v1035_v40, 0.0  ;;  %v1100_v13 = vmax.f32 %v1036_v5, 0.0  ;;  %1795 = vset.pattern.permute.xlu1 %v2744_v34  ;;  %1379 = vmatprep.subr.bf16.mxu0 %v1172_v33  ;;  %v516_v33 = vmul.f32 %v2327_v19, %v2407_v16 }
  0xee   : > { %v903_v1 = vpop.permute.xlu0 %902  ;;  %660 = vperm.xlu1 %1795, %v309_v49   ;;  %1380 = vmatpush1.bf16.msra.mxu0 %v1171_v7  ;;  %v1101_v49 = vmax.f32 %v1037_v57, 0.0  ;;  %v788_v20 = vadd.f32 %v724_v9, %v514_v38  ;;  %v517_v7 = vmul.f32 %v2324_v55, %v2422_v10 }
  0xef   : > { %v1039_v28 = vadd.f32 %v903_v1, %v783_v61  ;;  %v1040_v12 = vadd.f32 %v903_v1, %v784_v60  ;;  %v605_v0 = vpop.permute.xlu1 %604  ;;  %v1174_v46 = vpack.c.bf16 %v1100_v13, %v1098_v30  ;;  %v1173_v15 = vpack.c.bf16 %v1099_v4, %v1097_v24  ;;  %v857_v13 = vld [vmem:[%s2717_s2 + $0xc0] sm:$0xff] }
  0xf0   : > { %v727_v5 = vmul.f32 %v2319_v48, %v605_v0  ;;  %v728_v60 = vmul.f32 %v2321_v51, %v605_v0  ;;  %v726_v30 = vmul.f32 %v2321_v51, %v2228_v63 }
  0xf1   : > { %v1103_v27 = vmax.f32 %v1039_v28, 0.0  ;;  %v1104_v26 = vmax.f32 %v1040_v12, 0.0  ;;  %1381 = vmatprep.subr.bf16.mxu0 %v1174_v46 }
  0xf2   : > { %v913_v36 = vpop.permute.xlu0 %912  ;;  %1796 = vset.pattern.permute.xlu1 %v2745_v53  ;;  %1382 = vmatpush1.bf16.msra.mxu0 %v1173_v15  ;;  %v792_v52 = vadd.f32 %v728_v60, %v518_v50  ;;  %v790_v1 = vadd.f32 %v726_v30, %v516_v33  ;;  %v315_v60 = vld [vmem:[%s2716_s1 + $0xf8] sm:$0xff] }
  0xf3   : > { %977 = vperm.xlu1 %1796, %v855_v39   ;;  %v1176_v21 = vpack.c.bf16 %v1104_v26, %v1102_v42  ;;  %v1043_v37 = vadd.f32 %v913_v36, %v787_v6  ;;  %v1044_v43 = vadd.f32 %v913_v36, %v788_v20  ;;  %v1175_v35 = vpack.c.bf16 %v1103_v27, %v1101_v49  ;;  %v313_v39 = vld [vmem:[%s2716_s1 + $0xe8] sm:$0xff] }
  0xf4   : > { %v908_v44 = vpop.permute.xlu1 %907 }
  0xf5   : > { %v1041_v47 = vadd.f32 %v908_v44, %v785_v31  ;;  %v1042_v54 = vadd.f32 %v908_v44, %v786_v58  ;;  %1383 = vmatprep.subr.bf16.mxu0 %v1176_v21  ;;  %v1107_v59 = vmax.f32 %v1043_v37, 0.0  ;;  %v1108_v61 = vmax.f32 %v1044_v43, 0.0 }
  0xf6   : > { %1384 = vmatpush1.bf16.msra.mxu0 %v1175_v35  ;;  %v923_v4 = vpop.permute.xlu0 %922  ;;  %v730_v31 = vmul.f32 %v2321_v51, %v2236_v2 }
  0xf7   : > { %v1105_v32 = vmax.f32 %v1041_v47, 0.0  ;;  %v1106_v17 = vmax.f32 %v1042_v54, 0.0  ;;  %448 = vperm.xlu1 %1796, %v2090_v22   ;;  %v725_v22 = vmul.f32 %v2319_v48, %v2228_v63  ;;  %v791_v63 = vadd.f32 %v727_v5, %v517_v7  ;;  %v859_v47 = vld [vmem:[%s2717_s2 + $0xd0] sm:$0xff] }
  0xf8   : > { %v379_v62 = vpop.permute.xlu1 %378  ;;  %v1048_v57 = vadd.f32 %v923_v4, %v792_v52 }
  0xf9   : > { %v1178_v41 = vpack.c.bf16 %v1108_v61, %v1106_v17  ;;  %v1177_v24 = vpack.c.bf16 %v1107_v59, %v1105_v32  ;;  %v1047_v9 = vadd.f32 %v923_v4, %v791_v63  ;;  %v789_v16 = vadd.f32 %v725_v22, %v515_v29 }
  0xfa   : > { %v1112_v10 = vmax.f32 %v1048_v57, 0.0  ;;  %v519_v58 = vmul.f32 %v2324_v55, %v379_v62  ;;  %v520_v21 = vmul.f32 %v2327_v19, %v379_v62  ;;  %v933_v35 = vpop.permute.xlu0 %932  ;;  %v734_v4 = vmul.f32 %v2321_v51, %v2247_v8 }
  0xfb   : > { %453 = vperm.xlu1 %1796, %v311_v56   ;;  %1385 = vmatprep.subr.bf16.mxu0 %v1178_v41  ;;  %v1111_v46 = vmax.f32 %v1047_v9, 0.0 }
  0xfc   : > { %v384_v40 = vpop.permute.xlu1 %383  ;;  %1386 = vmatpush1.bf16.msra.mxu0 %v1177_v24 }
  0xfd   : > { %v521_v6 = vmul.f32 %v2324_v55, %v384_v40  ;;  %v522_v20 = vmul.f32 %v2327_v19, %v384_v40 }
  0xff   : > { %1797 = vset.pattern.permute.xlu1 %v2744_v34 }
 0x100   : > { %668 = vperm.xlu1 %1797, %v311_v56  }
 0x101   : > { %v613_v45 = vpop.permute.xlu1 %612 }
 0x102   : > { %v731_v49 = vmul.f32 %v2319_v48, %v613_v45  ;;  %v732_v36 = vmul.f32 %v2321_v51, %v613_v45 }
 0x104   : > { %1798 = vset.pattern.permute.xlu1 %v2745_v53  ;;  %v795_v37 = vadd.f32 %v731_v49, %v521_v6  ;;  %v796_v43 = vadd.f32 %v732_v36, %v522_v20  ;;  %v1202_v6 = vld [vmem:[%s2719_s4 + $0x8] sm:$0xff] }
 0x105   : > { %987 = vperm.xlu1 %1798, %v857_v13  }
 0x106   : > { %v918_v28 = vpop.permute.xlu1 %917  ;;  %v1051_v54 = vadd.f32 %v933_v35, %v795_v37  ;;  %v1052_v32 = vadd.f32 %v933_v35, %v796_v43  ;;  %v738_v37 = vmul.f32 %v2321_v51, %v2254_v11  ;;  %v1204_v43 = vld [vmem:[%s2719_s4 + $0x18] sm:$0xff] }
 0x107   : > { %v1045_v12 = vadd.f32 %v918_v28, %v789_v16  ;;  %v1046_v0 = vadd.f32 %v918_v28, %v790_v1  ;;  %v943_v16 = vpop.permute.xlu0 %942  ;;  %v861_v1 = vld [vmem:[%s2717_s2 + $0xe0] sm:$0xff] }
 0x108   : > { %v1115_v41 = vmax.f32 %v1051_v54, 0.0  ;;  %v1116_v62 = vmax.f32 %v1052_v32, 0.0 }
 0x109   : > { %v1109_v15 = vmax.f32 %v1045_v12, 0.0  ;;  %v1110_v3 = vmax.f32 %v1046_v0, 0.0  ;;  %458 = vperm.xlu1 %1798, %v2097_v23   ;;  %v729_v23 = vmul.f32 %v2319_v48, %v2236_v2  ;;  %v794_v2 = vadd.f32 %v730_v31, %v520_v21 }
 0x10a   : > { %v389_v38 = vpop.permute.xlu1 %388  ;;  %v737_v21 = vmul.f32 %v2319_v48, %v2254_v11  ;;  %v1206_v11 = vld [vmem:[%s2719_s4 + $0x28] sm:$0xff] }
 0x10b   : > { %v1180_v42 = vpack.c.bf16 %v1112_v10, %v1110_v3  ;;  %v1179_v27 = vpack.c.bf16 %v1111_v46, %v1109_v15  ;;  %v793_v17 = vadd.f32 %v729_v23, %v519_v58  ;;  %v523_v13 = vmul.f32 %v2324_v55, %v389_v38  ;;  %v863_v46 = vld [vmem:[%s2717_s2 + $0xf0] sm:$0xff] }
 0x10c   : > { %v524_v63 = vmul.f32 %v2327_v19, %v389_v38 }
 0x10d   : > { %463 = vperm.xlu1 %1798, %v313_v39   ;;  %1387 = vmatprep.subr.bf16.mxu0 %v1180_v42 }
 0x10e   : > { %v394_v26 = vpop.permute.xlu1 %393  ;;  %1388 = vmatpush1.bf16.msra.mxu0 %v1179_v27 }
 0x10f   : > { %v525_v50 = vmul.f32 %v2324_v55, %v394_v26  ;;  %v526_v45 = vmul.f32 %v2327_v19, %v394_v26 }
 0x111   : > { %1799 = vset.pattern.permute.xlu1 %v2744_v34 }
 0x112   : > { %676 = vperm.xlu1 %1799, %v313_v39  }
 0x113   : > { %v621_v44 = vpop.permute.xlu1 %620 }
 0x114   : > { %v735_v33 = vmul.f32 %v2319_v48, %v621_v44  ;;  %v736_v7 = vmul.f32 %v2321_v51, %v621_v44 }
 0x116   : > { %1800 = vset.pattern.permute.xlu1 %v2745_v53  ;;  %v799_v52 = vadd.f32 %v735_v33, %v525_v50  ;;  %v800_v9 = vadd.f32 %v736_v7, %v526_v45  ;;  %v1210_v45 = vld [vmem:[%s2719_s4 + $0x48] sm:$0xff] }
 0x117   : > { %997 = vperm.xlu1 %1800, %v859_v47  }
 0x118   : > { %v928_v59 = vpop.permute.xlu1 %927  ;;  %v1056_v28 = vadd.f32 %v943_v16, %v800_v9 }
 0x119   : > { %v1049_v61 = vadd.f32 %v928_v59, %v793_v17  ;;  %v1050_v56 = vadd.f32 %v928_v59, %v794_v2  ;;  %v953_v17 = vpop.permute.xlu0 %952  ;;  %v1806_v2 = vld [vmem:[%s2718_s3 + $0x4] ss:$8 sps:$4 sm:$0xff]  }
 0x11a   : > { %v1120_v38 = vmax.f32 %v1056_v28, 0.0  ;;  %1409 = vmatprep.mubr.bf16.mxu0 %v1806_v2  ;;  %v746_v2 = vmul.f32 %v2321_v51, %v2269_v18 }
 0x11b   : > { %v1113_v24 = vmax.f32 %v1049_v61, 0.0  ;;  %v1114_v40 = vmax.f32 %v1050_v56, 0.0  ;;  %468 = vperm.xlu1 %1800, %v2106_v25   ;;  %v733_v25 = vmul.f32 %v2319_v48, %v2247_v8  ;;  %v798_v8 = vadd.f32 %v734_v4, %v524_v63  ;;  %v1212_v63 = vld [vmem:[%s2719_s4 + $0x58] sm:$0xff] }
 0x11c   : > { %v399_v5 = vpop.permute.xlu1 %398 }
 0x11d   : > { %v1182_v22 = vpack.c.bf16 %v1116_v62, %v1114_v40  ;;  %v1181_v30 = vpack.c.bf16 %v1115_v41, %v1113_v24  ;;  %v797_v12 = vadd.f32 %v733_v25, %v523_v13  ;;  %v527_v44 = vmul.f32 %v2324_v55, %v399_v5 }
 0x11e   : > { %v528_v35 = vmul.f32 %v2327_v19, %v399_v5  ;;  %v1208_v5 = vld [vmem:[%s2719_s4 + $0x38] sm:$0xff] }
 0x11f   : > { %473 = vperm.xlu1 %1800, %v315_v60   ;;  %1389 = vmatprep.subr.bf16.mxu0 %v1182_v22  ;;  %v801_v56 = vadd.f32 %v737_v21, %v527_v44 }
 0x120   : > { %v404_v29 = vpop.permute.xlu1 %403  ;;  %1390 = vmatpush1.bf16.msra.mxu0 %v1181_v30  ;;  %v802_v41 = vadd.f32 %v738_v37, %v528_v35 }
 0x121   : > { %v529_v31 = vmul.f32 %v2324_v55, %v404_v29  ;;  %v530_v58 = vmul.f32 %v2327_v19, %v404_v29 }
 0x123   : > { %1802 = vset.pattern.permute.xlu1 %v2744_v34  ;;  %v1055_v34 = vadd.f32 %v943_v16, %v799_v52 }
 0x124   : > { %684 = vperm.xlu1 %1802, %v315_v60  }
 0x125   : > { %v629_v57 = vpop.permute.xlu1 %628  ;;  %v1119_v3 = vmax.f32 %v1055_v34, 0.0 }
 0x126   : > { %v739_v20 = vmul.f32 %v2319_v48, %v629_v57  ;;  %v740_v23 = vmul.f32 %v2321_v51, %v629_v57 }
 0x128   : > { %1803 = vset.pattern.permute.xlu1 %v2745_v53  ;;  %v864_v53 = vld [vmem:[%s2717_s2 + $0xf8] sm:$0xff]  ;;  %v803_v47 = vadd.f32 %v739_v20, %v529_v31  ;;  %v804_v54 = vadd.f32 %v740_v23, %v530_v58 }
 0x129   : > { %1007 = vperm.xlu1 %1803, %v861_v1  }
 0x12a   : > { %v938_v0 = vpop.permute.xlu1 %937  ;;  %v1059_v59 = vadd.f32 %v953_v17, %v803_v47  ;;  %v1060_v61 = vadd.f32 %v953_v17, %v804_v54  ;;  %v745_v17 = vmul.f32 %v2319_v48, %v2269_v18 }
 0x12b   : > { %v1053_v10 = vadd.f32 %v938_v0, %v797_v12  ;;  %v1054_v15 = vadd.f32 %v938_v0, %v798_v8  ;;  %v1214_v12 = vld [vmem:[%s2719_s4 + $0x68] sm:$0xff]  ;;  %v741_v8 = vmul.f32 %v2319_v48, %v2262_v14  ;;  %v742_v0 = vmul.f32 %v2321_v51, %v2262_v14 }
 0x12c   : > { %v1123_v60 = vmax.f32 %v1059_v59, 0.0  ;;  %v1124_v22 = vmax.f32 %v1060_v61, 0.0 }
 0x12d   : > { %v1117_v39 = vmax.f32 %v1053_v10, 0.0  ;;  %v1118_v42 = vmax.f32 %v1054_v15, 0.0  ;;  %1017 = vperm.xlu1 %1803, %v863_v46   ;;  %v963_v46 = vpop.permute.xlu0 %962 }
 0x12e   : > { %v409_v27 = vpop.permute.xlu1 %408 }
 0x12f   : > { %v1184_v26 = vpack.c.bf16 %v1120_v38, %v1118_v42  ;;  %v1183_v49 = vpack.c.bf16 %v1119_v3, %v1117_v39  ;;  %v531_v57 = vmul.f32 %v2324_v55, %v409_v27  ;;  %v532_v16 = vmul.f32 %v2327_v19, %v409_v27  ;;  %v1216_v42 = vld [vmem:[%s2719_s4 + $0x78] sm:$0xff] }
 0x131   : > { %1022 = vperm.xlu1 %1803, %v864_v53   ;;  %1391 = vmatprep.subr.bf16.mxu0 %v1184_v26  ;;  %v805_v3 = vadd.f32 %v741_v8, %v531_v57  ;;  %v806_v38 = vadd.f32 %v742_v0, %v532_v16  ;;  %v2746_v16 = vld [vmem:[#allocation6_spill] sm:$0xff] }
 0x132   : > { %v414_v36 = vpop.permute.xlu1 %413  ;;  %1392 = vmatpush1.bf16.msra.mxu0 %v1183_v49 }
 0x133   : > { %v533_v52 = vmul.f32 %v2324_v55, %v414_v36  ;;  %v534_v9 = vmul.f32 %v2327_v19, %v414_v36 }
 0x135   : > { %1224 = vperm.xlu1 %1803, %v1202_v6  }
 0x137   : > { %v637_v32 = vpop.permute.xlu1 %636 }
 0x138   : > { %v743_v4 = vmul.f32 %v2319_v48, %v637_v32  ;;  %v744_v13 = vmul.f32 %v2321_v51, %v637_v32 }
 0x139   : > { %1234 = vperm.xlu1 %1803, %v1204_v43  }
 0x13a   : > { %v807_v1 = vadd.f32 %v743_v4, %v533_v52  ;;  %v808_v34 = vadd.f32 %v744_v13, %v534_v9 }
 0x13c   : > { %v948_v62 = vpop.permute.xlu1 %947  ;;  %v1063_v10 = vadd.f32 %v963_v46, %v807_v1  ;;  %v1064_v15 = vadd.f32 %v963_v46, %v808_v34  ;;  %v749_v1 = vmul.f32 %v2319_v48, %v2746_v16  ;;  %v750_v34 = vmul.f32 %v2321_v51, %v2746_v16 }
 0x13d   : > { %v1057_v24 = vadd.f32 %v948_v62, %v801_v56  ;;  %v1058_v40 = vadd.f32 %v948_v62, %v802_v41  ;;  %1244 = vperm.xlu1 %1803, %v1206_v11   ;;  %v973_v11 = vpop.permute.xlu0 %972 }
 0x13e   : > { %v1128_v36 = vmax.f32 %v1064_v15, 0.0  ;;  %v1127_v6 = vmax.f32 %v1063_v10, 0.0 }
 0x13f   : > { %v1121_v30 = vmax.f32 %v1057_v24, 0.0  ;;  %v1122_v29 = vmax.f32 %v1058_v40, 0.0 }
 0x140   : > { %v419_v33 = vpop.permute.xlu1 %418 }
 0x141   : > { %1254 = vperm.xlu1 %1803, %v1208_v5   ;;  %v1186_v7 = vpack.c.bf16 %v1124_v22, %v1122_v29  ;;  %v1185_v50 = vpack.c.bf16 %v1123_v60, %v1121_v30  ;;  %v535_v44 = vmul.f32 %v2324_v55, %v419_v33  ;;  %v536_v35 = vmul.f32 %v2327_v19, %v419_v33 }
 0x143   : > { %1393 = vmatprep.subr.bf16.mxu0 %v1186_v7  ;;  %v809_v56 = vadd.f32 %v745_v17, %v535_v44  ;;  %v810_v41 = vadd.f32 %v746_v2, %v536_v35  ;;  %v2747_v44 = vld [vmem:[#allocation7_spill] sm:$0xff] }
 0x144   : > { %v424_v25 = vpop.permute.xlu1 %423  ;;  %1394 = vmatpush1.bf16.msra.mxu0 %v1185_v50  ;;  %v753_v35 = vmul.f32 %v2319_v48, %v2747_v44 }
 0x145   : > { %1264 = vperm.xlu1 %1803, %v1210_v45   ;;  %v537_v37 = vmul.f32 %v2324_v55, %v424_v25  ;;  %v538_v43 = vmul.f32 %v2327_v19, %v424_v25 }
 0x149   : > { %1274 = vperm.xlu1 %1803, %v1212_v63   ;;  %v645_v28 = vpop.permute.xlu1 %644 }
 0x14a   : > { %v747_v58 = vmul.f32 %v2319_v48, %v645_v28  ;;  %v748_v21 = vmul.f32 %v2321_v51, %v645_v28  ;;  %v983_v28 = vpop.permute.xlu0 %982 }
 0x14c   : > { %v811_v47 = vadd.f32 %v747_v58, %v537_v37  ;;  %v812_v54 = vadd.f32 %v748_v21, %v538_v43 }
 0x14d   : > { %1284 = vperm.xlu1 %1803, %v1214_v12  }
 0x14e   : > { %v958_v39 = vpop.permute.xlu1 %957  ;;  %v1067_v59 = vadd.f32 %v973_v11, %v811_v47  ;;  %v1068_v61 = vadd.f32 %v973_v11, %v812_v54  ;;  %v754_v47 = vmul.f32 %v2321_v51, %v2747_v44  ;;  %v993_v54 = vpop.permute.xlu0 %992 }
 0x14f   : > { %v1061_v27 = vadd.f32 %v958_v39, %v805_v3  ;;  %v1062_v53 = vadd.f32 %v958_v39, %v806_v38 }
 0x150   : > { %v1132_v22 = vmax.f32 %v1068_v61, 0.0  ;;  %v1131_v30 = vmax.f32 %v1067_v59, 0.0 }
 0x151   : > { %v1125_v26 = vmax.f32 %v1061_v27, 0.0  ;;  %v1126_v49 = vmax.f32 %v1062_v53, 0.0  ;;  %1294 = vperm.xlu1 %1803, %v1216_v42  }
 0x152   : > { %v429_v20 = vpop.permute.xlu1 %428 }
 0x153   : > { %v1188_v14 = vpack.c.bf16 %v1128_v36, %v1126_v49  ;;  %v1187_v23 = vpack.c.bf16 %v1127_v6, %v1125_v26  ;;  %v539_v13 = vmul.f32 %v2324_v55, %v429_v20  ;;  %v540_v63 = vmul.f32 %v2327_v19, %v429_v20 }
 0x155   : > { %1395 = vmatprep.subr.bf16.mxu0 %v1188_v14  ;;  %v813_v0 = vadd.f32 %v749_v1, %v539_v13  ;;  %v814_v46 = vadd.f32 %v750_v34, %v540_v63  ;;  %v2748_v63 = vld [vmem:[#allocation9_spill] sm:$0xff] }
 0x156   : > { %v434_v31 = vpop.permute.xlu1 %433  ;;  %1396 = vmatpush1.bf16.msra.mxu0 %v1187_v23 }
 0x157   : > { %v541_v25 = vmul.f32 %v2324_v55, %v434_v31  ;;  %v542_v4 = vmul.f32 %v2327_v19, %v434_v31 }
 0x15b   : > { %v653_v32 = vpop.permute.xlu1 %652 }
 0x15c   : > { %v751_v18 = vmul.f32 %v2319_v48, %v653_v32  ;;  %v752_v45 = vmul.f32 %v2321_v51, %v653_v32 }
 0x15e   : > { %v815_v52 = vadd.f32 %v751_v18, %v541_v25  ;;  %v816_v9 = vadd.f32 %v752_v45, %v542_v4 }
 0x160   : > { %v968_v62 = vpop.permute.xlu1 %967  ;;  %v1071_v12 = vadd.f32 %v983_v28, %v815_v52  ;;  %v1072_v8 = vadd.f32 %v983_v28, %v816_v9  ;;  %v757_v52 = vmul.f32 %v2319_v48, %v2748_v63  ;;  %v758_v9 = vmul.f32 %v2321_v51, %v2748_v63 }
 0x161   : > { %v1065_v24 = vadd.f32 %v968_v62, %v809_v56  ;;  %v1066_v40 = vadd.f32 %v968_v62, %v810_v41 }
 0x162   : > { %v1136_v42 = vmax.f32 %v1072_v8, 0.0  ;;  %v1135_v27 = vmax.f32 %v1071_v12, 0.0 }
 0x163   : > { %v1129_v5 = vmax.f32 %v1065_v24, 0.0  ;;  %v1130_v60 = vmax.f32 %v1066_v40, 0.0 }
 0x164   : > { %v439_v29 = vpop.permute.xlu1 %438 }
 0x165   : > { %v1190_v33 = vpack.c.bf16 %v1132_v22, %v1130_v60  ;;  %v1189_v7 = vpack.c.bf16 %v1131_v30, %v1129_v5  ;;  %v543_v31 = vmul.f32 %v2324_v55, %v439_v29  ;;  %v544_v58 = vmul.f32 %v2327_v19, %v439_v29 }
 0x167   : > { %1397 = vmatprep.subr.bf16.mxu0 %v1190_v33  ;;  %v817_v2 = vadd.f32 %v753_v35, %v543_v31  ;;  %v818_v11 = vadd.f32 %v754_v47, %v544_v58  ;;  %v2749_v58 = vld [vmem:[#allocation10_spill] sm:$0xff] }
 0x168   : > { %v444_v50 = vpop.permute.xlu1 %443  ;;  %1398 = vmatpush1.bf16.msra.mxu0 %v1189_v7 }
 0x169   : > { %v545_v14 = vmul.f32 %v2324_v55, %v444_v50  ;;  %v546_v23 = vmul.f32 %v2327_v19, %v444_v50 }
 0x16d   : > { %v661_v57 = vpop.permute.xlu1 %660 }
 0x16e   : > { %v755_v6 = vmul.f32 %v2319_v48, %v661_v57  ;;  %v756_v20 = vmul.f32 %v2321_v51, %v661_v57  ;;  %v1003_v57 = vpop.permute.xlu0 %1002 }
 0x170   : > { %v819_v21 = vadd.f32 %v755_v6, %v545_v14  ;;  %v820_v37 = vadd.f32 %v756_v20, %v546_v23 }
 0x172   : > { %v978_v10 = vpop.permute.xlu1 %977  ;;  %v1075_v32 = vadd.f32 %v993_v54, %v819_v21  ;;  %v1076_v17 = vadd.f32 %v993_v54, %v820_v37  ;;  %v761_v21 = vmul.f32 %v2319_v48, %v2749_v58  ;;  %v762_v37 = vmul.f32 %v2321_v51, %v2749_v58 }
 0x173   : > { %v1069_v15 = vadd.f32 %v978_v10, %v813_v0  ;;  %v1070_v3 = vadd.f32 %v978_v10, %v814_v46 }
 0x174   : > { %v1140_v24 = vmax.f32 %v1076_v17, 0.0  ;;  %v1139_v40 = vmax.f32 %v1075_v32, 0.0 }
 0x175   : > { %v1133_v38 = vmax.f32 %v1069_v15, 0.0  ;;  %v1134_v39 = vmax.f32 %v1070_v3, 0.0 }
 0x176   : > { %v449_v53 = vpop.permute.xlu1 %448 }
 0x177   : > { %v1192_v26 = vpack.c.bf16 %v1136_v42, %v1134_v39  ;;  %v1191_v49 = vpack.c.bf16 %v1135_v27, %v1133_v38  ;;  %v547_v18 = vmul.f32 %v2324_v55, %v449_v53  ;;  %v548_v45 = vmul.f32 %v2327_v19, %v449_v53 }
 0x179   : > { %1399 = vmatprep.subr.bf16.mxu0 %v1192_v26  ;;  %v821_v34 = vadd.f32 %v757_v52, %v547_v18  ;;  %v822_v28 = vadd.f32 %v758_v9, %v548_v45 }
 0x17a   : > { %v454_v36 = vpop.permute.xlu1 %453  ;;  %1400 = vmatpush1.bf16.msra.mxu0 %v1191_v49 }
 0x17b   : > { %v549_v7 = vmul.f32 %v2324_v55, %v454_v36  ;;  %v550_v50 = vmul.f32 %v2327_v19, %v454_v36 }
 0x17f   : > { %v669_v43 = vpop.permute.xlu1 %668 }
 0x180   : > { %v759_v29 = vmul.f32 %v2319_v48, %v669_v43  ;;  %v760_v33 = vmul.f32 %v2321_v51, %v669_v43  ;;  %v1013_v43 = vpop.permute.xlu0 %1012 }
 0x182   : > { %v823_v25 = vadd.f32 %v759_v29, %v549_v7  ;;  %v824_v4 = vadd.f32 %v760_v33, %v550_v50 }
 0x184   : > { %v988_v59 = vpop.permute.xlu1 %987  ;;  %v1079_v16 = vadd.f32 %v1003_v57, %v823_v25  ;;  %v1080_v1 = vadd.f32 %v1003_v57, %v824_v4 }
 0x185   : > { %v1073_v61 = vadd.f32 %v988_v59, %v817_v2  ;;  %v1074_v56 = vadd.f32 %v988_v59, %v818_v11 }
 0x186   : > { %v1144_v15 = vmax.f32 %v1080_v1, 0.0  ;;  %v1143_v3 = vmax.f32 %v1079_v16, 0.0 }
 0x187   : > { %v1137_v41 = vmax.f32 %v1073_v61, 0.0  ;;  %v1138_v62 = vmax.f32 %v1074_v56, 0.0  ;;  %v2750_v61 = vld [vmem:[#allocation12_spill] sm:$0xff] }
 0x188   : > { %v459_v5 = vpop.permute.xlu1 %458  ;;  %v765_v56 = vmul.f32 %v2319_v48, %v2750_v61 }
 0x189   : > { %v1194_v60 = vpack.c.bf16 %v1140_v24, %v1138_v62  ;;  %v1193_v22 = vpack.c.bf16 %v1139_v40, %v1137_v41  ;;  %v551_v14 = vmul.f32 %v2324_v55, %v459_v5  ;;  %v552_v23 = vmul.f32 %v2327_v19, %v459_v5 }
 0x18a   : > { %v766_v41 = vmul.f32 %v2321_v51, %v2750_v61 }
 0x18b   : > { %1401 = vmatprep.subr.bf16.mxu0 %v1194_v60  ;;  %v825_v47 = vadd.f32 %v761_v21, %v551_v14  ;;  %v826_v54 = vadd.f32 %v762_v37, %v552_v23 }
 0x18c   : > { %v464_v30 = vpop.permute.xlu1 %463  ;;  %1402 = vmatpush1.bf16.msra.mxu0 %v1193_v22 }
 0x18d   : > { %v553_v49 = vmul.f32 %v2324_v55, %v464_v30  ;;  %v554_v36 = vmul.f32 %v2327_v19, %v464_v30 }
 0x191   : > { %v677_v13 = vpop.permute.xlu1 %676 }
 0x192   : > { %v763_v27 = vmul.f32 %v2319_v48, %v677_v13  ;;  %v764_v53 = vmul.f32 %v2321_v51, %v677_v13 }
 0x194   : > { %v827_v6 = vadd.f32 %v763_v27, %v553_v49  ;;  %v828_v20 = vadd.f32 %v764_v53, %v554_v36  ;;  %v1824_v27 = vld [vmem:[%s2718_s3 + $0x60] ss:$8 sps:$4 sm:$0xff]   ;;  %v1825_v53 = vld [vmem:[%s2718_s3 + $0x74] ss:$8 sps:$4 sm:$0xff]   ;;  %v1220_v49 = vpop.permute.xlu0 %1219 }
 0x196   : > { %v998_v12 = vpop.permute.xlu1 %997  ;;  %v1083_v44 = vadd.f32 %v1013_v43, %v827_v6  ;;  %v1084_v35 = vadd.f32 %v1013_v43, %v828_v20 }
 0x197   : > { %v1077_v8 = vadd.f32 %v998_v12, %v821_v34  ;;  %v1078_v0 = vadd.f32 %v998_v12, %v822_v28  ;;  %v1809_v12 = vld [vmem:[%s2718_s3 + $0x10] ss:$8 sps:$4 sm:$0xff]  }
 0x198   : > { %v1148_v62 = vmax.f32 %v1084_v35, 0.0  ;;  %v1147_v24 = vmax.f32 %v1083_v44, 0.0 }
 0x199   : > { %v1141_v46 = vmax.f32 %v1077_v8, 0.0  ;;  %v1142_v10 = vmax.f32 %v1078_v0, 0.0  ;;  %v1810_v8 = vld [vmem:[%s2718_s3 + $0x24] ss:$8 sps:$4 sm:$0xff]   ;;  %v1812_v0 = vld [vmem:[%s2718_s3 + $0x20] ss:$8 sps:$4 sm:$0xff]  }
 0x19a   : > { %v469_v38 = vpop.permute.xlu1 %468 }
 0x19b   : > { %v1196_v39 = vpack.c.bf16 %v1144_v15, %v1142_v10  ;;  %v1195_v42 = vpack.c.bf16 %v1143_v3, %v1141_v46  ;;  %v555_v32 = vmul.f32 %v2324_v55, %v469_v38  ;;  %v556_v17 = vmul.f32 %v2327_v19, %v469_v38  ;;  %v1813_v46 = vld [vmem:[%s2718_s3 + $0x34] ss:$8 sps:$4 sm:$0xff]   ;;  %v1815_v10 = vld [vmem:[%s2718_s3 + $0x30] ss:$8 sps:$4 sm:$0xff]   ;;  %v1816_v15 = vld [vmem:[%s2718_s3 + $0x44] ss:$8 sps:$4 sm:$0xff]  }
 0x19c   : > { %v1818_v3 = vld [vmem:[%s2718_s3 + $0x40] ss:$8 sps:$4 sm:$0xff]   ;;  %v1819_v38 = vld [vmem:[%s2718_s3 + $0x54] ss:$8 sps:$4 sm:$0xff]  }
 0x19d   : > { %1403 = vmatprep.subr.bf16.mxu0 %v1196_v39  ;;  %v829_v29 = vadd.f32 %v765_v56, %v555_v32  ;;  %v830_v33 = vadd.f32 %v766_v41, %v556_v17  ;;  %v1821_v39 = vld [vmem:[%s2718_s3 + $0x50] ss:$8 sps:$4 sm:$0xff]   ;;  %v1230_v32 = vpop.permute.xlu0 %1229 }
 0x19e   : > { %v474_v26 = vpop.permute.xlu1 %473  ;;  %1404 = vmatpush1.bf16.msra.mxu0 %v1195_v42  ;;  %v1822_v42 = vld [vmem:[%s2718_s3 + $0x64] ss:$8 sps:$4 sm:$0xff]  }
 0x19f   : > { %v557_v7 = vmul.f32 %v2324_v55, %v474_v26  ;;  %v558_v50 = vmul.f32 %v2327_v19, %v474_v26  ;;  %v1804_v55 = vld [vmem:[%s2718_s3] ss:$8 sps:$4 sm:$0xff]   ;;  %v1807_v19 = vld [vmem:[%s2718_s3 + $0x14] ss:$8 sps:$4 sm:$0xff]   ;;  %v1827_v26 = vld [vmem:[%s2718_s3 + $0x70] ss:$8 sps:$4 sm:$0xff]  }
 0x1a3   : > { %v685_v31 = vpop.permute.xlu1 %684 }
 0x1a4   : > { %v767_v40 = vmul.f32 %v2319_v48, %v685_v31  ;;  %v768_v5 = vmul.f32 %v2321_v51, %v685_v31 }
 0x1a6   : > { %v831_v13 = vadd.f32 %v767_v40, %v557_v7  ;;  %v832_v63 = vadd.f32 %v768_v5, %v558_v50 }
 0x1a8   : > { %v1008_v2 = vpop.permute.xlu1 %1007 }
 0x1a9   : > { %v1081_v11 = vadd.f32 %v1008_v2, %v825_v47  ;;  %v1082_v59 = vadd.f32 %v1008_v2, %v826_v54 }
 0x1ab   : > { %v1145_v60 = vmax.f32 %v1081_v11, 0.0  ;;  %v1146_v22 = vmax.f32 %v1082_v59, 0.0 }
 0x1ac   : > { %v1018_v30 = vpop.permute.xlu1 %1017 }
 0x1ad   : > { %v1198_v18 = vpack.c.bf16 %v1148_v62, %v1146_v22  ;;  %v1197_v45 = vpack.c.bf16 %v1147_v24, %v1145_v60  ;;  %v1085_v25 = vadd.f32 %v1018_v30, %v829_v29  ;;  %v1086_v4 = vadd.f32 %v1018_v30, %v830_v33  ;;  %v1240_v33 = vpop.permute.xlu0 %1239 }
 0x1af   : > { %1405 = vmatprep.subr.bf16.mxu0 %v1198_v18  ;;  %v1149_v9 = vmax.f32 %v1085_v25, 0.0  ;;  %v1150_v57 = vmax.f32 %v1086_v4, 0.0 }
 0x1b0   : > { %v1023_v52 = vpop.permute.xlu1 %1022  ;;  %1406 = vmatpush1.bf16.msra.mxu0 %v1197_v45 }
 0x1b1   : > { %v1087_v48 = vadd.f32 %v1023_v52, %v831_v13  ;;  %v1088_v51 = vadd.f32 %v1023_v52, %v832_v63 }
 0x1b3   : > { %v1151_v16 = vmax.f32 %v1087_v48, 0.0  ;;  %v1152_v1 = vmax.f32 %v1088_v51, 0.0 }
 0x1b4   : > { %v1225_v14 = vpop.permute.xlu1 %1224 }
 0x1b5   : > { %v1200_v34 = vpack.c.bf16 %v1152_v1, %v1150_v57  ;;  %v1199_v28 = vpack.c.bf16 %v1151_v16, %v1149_v9 }
 0x1b7   : > { %1407 = vmatprep.subr.bf16.mxu0 %v1200_v34  ;;  %v1250_v34 = vpop.permute.xlu0 %1249 }
 0x1b8   : > { %1408 = vmatpush1.bf16.msra.mxu0 %v1199_v28  ;;  %v1235_v61 = vpop.permute.xlu1 %1234 }
 0x1bb   : > { %1410 = vmatmul.mubr.bf16.vlgmr.msra.gmra.mrb[0].mxu0 %v1804_v55 }
 0x1bc   : > { %1419 = vmatprep.mubr.bf16.mxu0 %v1807_v19  ;;  %v1245_v25 = vpop.permute.xlu1 %1244 }
 0x1c3   : > { %1420 = vmatmul.mubr.bf16.gmra.mrb[4].mxu0 %v1809_v12 }
 0x1c4   : > { %1429 = vmatprep.mubr.bf16.mxu0 %v1810_v8  ;;  %v1255_v8 = vpop.permute.xlu1 %1254 }
 0x1cb   : > { %1430 = vmatmul.mubr.bf16.gmra.mrb[8].mxu0 %v1812_v0 }
 0x1cc   : > { %1439 = vmatprep.mubr.bf16.mxu0 %v1813_v46 }
 0x1d3   : > { %1440 = vmatmul.mubr.bf16.gmra.mrb[12].mxu0 %v1815_v10 }
 0x1d4   : > { %1449 = vmatprep.mubr.bf16.mxu0 %v1816_v15 }
 0x1db   : > { %1450 = vmatmul.mubr.bf16.gmra.mrb[16].mxu0 %v1818_v3 }
 0x1dc   : > { %1459 = vmatprep.mubr.bf16.mxu0 %v1819_v38 }
 0x1e3   : > { %1460 = vmatmul.mubr.bf16.gmra.mrb[20].mxu0 %v1821_v39 }
 0x1e4   : > { %1469 = vmatprep.mubr.bf16.mxu0 %v1822_v42 }
 0x1eb   : > { %1470 = vmatmul.mubr.bf16.gmra.mrb[24].mxu0 %v1824_v27 }
 0x1ec   : > { %1479 = vmatprep.mubr.bf16.mxu0 %v1825_v53 }
 0x1f3   : > { %1480 = vmatmul.mubr.bf16.gmra.mrb[28].mxu0 %v1827_v26  ;;  %v1260_v26 = vpop.permute.xlu0 %1259 }
 0x28e   : > { %v1411_v36 = vpop.f32.mrb[0].mxu0 }
 0x28f   : > { %v1412_v6 = vadd.f32 %v1411_v36, %v1220_v49  ;;  %v1413_v20 = vpop.f32.mrb[1].mxu0 }
 0x290   : > { %v1414_v23 = vadd.f32 %v1413_v20, %v1220_v49  ;;  %v1415_v31 = vpop.f32.mrb[2].mxu0 }
 0x291   : > { %v1416_v58 = vadd.f32 %v1415_v31, %v1225_v14  ;;  %v1417_v21 = vpop.f32.mrb[3].mxu0  ;;  %v1490_v43 = vmax.f32 %v1412_v6, 0.0 }
 0x292   : > { %v1418_v37 = vadd.f32 %v1417_v21, %v1225_v14  ;;  %v1491_v35 = vmax.f32 %v1414_v23, 0.0  ;;  %v1265_v14 = vpop.permute.xlu1 %1264 }
 0x293   : > { %v1492_v44 = vmax.f32 %v1416_v58, 0.0 }
 0x294   : > { %v1493_v47 = vmax.f32 %v1418_v37, 0.0 }
 0x295   : > { %v1523_v54 = vpack.c.bf16 %v1492_v44, %v1490_v43 }
 0x296   : > { %v1421_v17 = vpop.f32.mrb[4].mxu0  ;;  %v1524_v2 = vpack.c.bf16 %v1493_v47, %v1491_v35 }
 0x297   : > { %v1422_v11 = vadd.f32 %v1421_v17, %v1230_v32  ;;  %v1423_v59 = vpop.f32.mrb[5].mxu0 }
 0x298   : > { %v1424_v56 = vadd.f32 %v1423_v59, %v1230_v32  ;;  %v1425_v41 = vpop.f32.mrb[6].mxu0  ;;  %1549 = vmatprep.subr.bf16.mxu1 %v1524_v2  ;;  %v1270_v32 = vpop.permute.xlu0 %1269 }
 0x299   : > { %v1426_v62 = vadd.f32 %v1425_v41, %v1235_v61  ;;  %v1427_v24 = vpop.f32.mrb[7].mxu0  ;;  %1550 = vmatpush1.bf16.msra.mxu1 %v1523_v54  ;;  %v1494_v5 = vmax.f32 %v1422_v11, 0.0 }
 0x29a   : > { %v1428_v40 = vadd.f32 %v1427_v24, %v1235_v61  ;;  %v1495_v22 = vmax.f32 %v1424_v56, 0.0  ;;  %v1275_v61 = vpop.permute.xlu1 %1274 }
 0x29b   : > { %v1496_v60 = vmax.f32 %v1426_v62, 0.0 }
 0x29c   : > { %v1497_v30 = vmax.f32 %v1428_v40, 0.0 }
 0x29d   : > { %v1525_v29 = vpack.c.bf16 %v1496_v60, %v1494_v5 }
 0x29e   : > { %v1526_v7 = vpack.c.bf16 %v1497_v30, %v1495_v22  ;;  %v1431_v50 = vpop.f32.mrb[8].mxu0 }
 0x29f   : > { %v1432_v18 = vadd.f32 %v1431_v50, %v1240_v33  ;;  %v1433_v45 = vpop.f32.mrb[9].mxu0 }
 0x2a0   : > { %v1434_v4 = vadd.f32 %v1433_v45, %v1240_v33  ;;  %v1435_v13 = vpop.f32.mrb[10].mxu0  ;;  %1551 = vmatprep.subr.bf16.mxu1 %v1526_v7  ;;  %v1280_v33 = vpop.permute.xlu0 %1279 }
 0x2a1   : > { %v1436_v63 = vadd.f32 %v1435_v13, %v1245_v25  ;;  %v1437_v52 = vpop.f32.mrb[11].mxu0  ;;  %1552 = vmatpush1.bf16.msra.mxu1 %v1525_v29  ;;  %v1498_v51 = vmax.f32 %v1432_v18, 0.0 }
 0x2a2   : > { %v1438_v48 = vadd.f32 %v1437_v52, %v1245_v25  ;;  %v1499_v57 = vmax.f32 %v1434_v4, 0.0  ;;  %v1285_v25 = vpop.permute.xlu1 %1284 }
 0x2a3   : > { %v1500_v9 = vmax.f32 %v1436_v63, 0.0 }
 0x2a4   : > { %v1501_v16 = vmax.f32 %v1438_v48, 0.0 }
 0x2a5   : > { %v1527_v1 = vpack.c.bf16 %v1500_v9, %v1498_v51 }
 0x2a6   : > { %v1528_v28 = vpack.c.bf16 %v1501_v16, %v1499_v57  ;;  %v1441_v55 = vpop.f32.mrb[12].mxu0 }
 0x2a7   : > { %v1442_v19 = vadd.f32 %v1441_v55, %v1250_v34  ;;  %v1443_v12 = vpop.f32.mrb[13].mxu0 }
 0x2a8   : > { %v1444_v0 = vadd.f32 %v1443_v12, %v1250_v34  ;;  %v1445_v46 = vpop.f32.mrb[14].mxu0  ;;  %1553 = vmatprep.subr.bf16.mxu1 %v1528_v28  ;;  %v1290_v34 = vpop.permute.xlu0 %1289 }
 0x2a9   : > { %v1446_v10 = vadd.f32 %v1445_v46, %v1255_v8  ;;  %v1447_v15 = vpop.f32.mrb[15].mxu0  ;;  %1554 = vmatpush1.bf16.msra.mxu1 %v1527_v1  ;;  %v1502_v38 = vmax.f32 %v1442_v19, 0.0 }
 0x2aa   : > { %v1448_v3 = vadd.f32 %v1447_v15, %v1255_v8  ;;  %v1503_v42 = vmax.f32 %v1444_v0, 0.0  ;;  %v1295_v8 = vpop.permute.xlu1 %1294 }
 0x2ab   : > { %v1504_v39 = vmax.f32 %v1446_v10, 0.0 }
 0x2ac   : > { %v1505_v27 = vmax.f32 %v1448_v3, 0.0 }
 0x2ad   : > { %v1529_v53 = vpack.c.bf16 %v1504_v39, %v1502_v38 }
 0x2ae   : > { %v1530_v49 = vpack.c.bf16 %v1505_v27, %v1503_v42  ;;  %v1451_v36 = vpop.f32.mrb[16].mxu0 }
 0x2af   : > { %v1452_v6 = vadd.f32 %v1451_v36, %v1260_v26  ;;  %v1453_v20 = vpop.f32.mrb[17].mxu0  ;;  %v1543_v36 = vpop.permute.xlu0 %1542 }
 0x2b0   : > { %v1454_v23 = vadd.f32 %v1453_v20, %v1260_v26  ;;  %v1455_v31 = vpop.f32.mrb[18].mxu0  ;;  %1555 = vmatprep.subr.bf16.mxu1 %v1530_v49  ;;  %v1522_v49 = vld [vmem:[%s2720_s5] sm:$0x1] }
 0x2b1   : > { %v1456_v58 = vadd.f32 %v1455_v31, %v1265_v14  ;;  %v1457_v21 = vpop.f32.mrb[19].mxu0  ;;  %1556 = vmatpush1.bf16.msra.mxu1 %v1529_v53  ;;  %v1506_v43 = vmax.f32 %v1452_v6, 0.0  ;;  %v2751_v6 = vld [vmem:[#allocation11_spill] sm:$0xff] }
 0x2b2   : > { %v1458_v37 = vadd.f32 %v1457_v21, %v1265_v14  ;;  %v1507_v35 = vmax.f32 %v1454_v23, 0.0  ;;  %v1548_v20 = vrot.slane %v1543_v36, %v2751_v6 }
 0x2b3   : > { %v1508_v44 = vmax.f32 %v1456_v58, 0.0 }
 0x2b4   : > { %v1509_v47 = vmax.f32 %v1458_v37, 0.0 }
 0x2b5   : > { %v1531_v54 = vpack.c.bf16 %v1508_v44, %v1506_v43 }
 0x2b6   : > { %v1532_v17 = vpack.c.bf16 %v1509_v47, %v1507_v35  ;;  %v1461_v2 = vpop.f32.mrb[20].mxu0 }
 0x2b7   : > { %v1462_v11 = vadd.f32 %v1461_v2, %v1270_v32  ;;  %v1463_v59 = vpop.f32.mrb[21].mxu0 }
 0x2b8   : > { %v1464_v56 = vadd.f32 %v1463_v59, %v1270_v32  ;;  %v1465_v41 = vpop.f32.mrb[22].mxu0  ;;  %1557 = vmatprep.subr.bf16.mxu1 %v1532_v17 }
 0x2b9   : > { %v1466_v62 = vadd.f32 %v1465_v41, %v1275_v61  ;;  %v1467_v24 = vpop.f32.mrb[23].mxu0  ;;  %1558 = vmatpush1.bf16.msra.mxu1 %v1531_v54  ;;  %v1510_v5 = vmax.f32 %v1462_v11, 0.0  ;;  %v1902_v11 = vmov 1966171168   ;;  %v2752_v41 = vld [vmem:[#allocation8_spill] sm:$0xff] }
 0x2ba   : > { %v1468_v40 = vadd.f32 %v1467_v24, %v1275_v61  ;;  %v1511_v22 = vmax.f32 %v1464_v56, 0.0  ;;  %v1606_v59 = vunpack.c.l.s4 %v1902_v11 }
 0x2bb   : > { %v1512_v60 = vmax.f32 %v1466_v62, 0.0 }
 0x2bc   : > { %v1513_v30 = vmax.f32 %v1468_v40, 0.0  ;;  %v1607_v61 = vunpack.c.0.s8 %v1606_v59 }
 0x2bd   : > { %v1533_v29 = vpack.c.bf16 %v1512_v60, %v1510_v5  ;;  %v2753_v60 = vlaneseq }
 0x2be   : > { %v1534_v7 = vpack.c.bf16 %v1513_v30, %v1511_v22  ;;  %v1471_v50 = vpop.f32.mrb[24].mxu0  ;;  %v1610_v62 = vsub.s32 %v1607_v61, %v2752_v41 }
 0x2bf   : > { %v1472_v18 = vadd.f32 %v1471_v50, %v1280_v33  ;;  %v1473_v45 = vpop.f32.mrb[25].mxu0  ;;  %vm1622_vm0 = vcmp.lt.s32.totalorder %v2753_v60, 256 }
 0x2c0   : > { %v1474_v4 = vadd.f32 %v1473_v45, %v1280_v33  ;;  %v1475_v13 = vpop.f32.mrb[26].mxu0  ;;  %1559 = vmatprep.subr.bf16.mxu1 %v1534_v7 }
 0x2c1   : > { %v1476_v63 = vadd.f32 %v1475_v13, %v1285_v25  ;;  %v1477_v52 = vpop.f32.mrb[27].mxu0  ;;  %1560 = vmatpush1.bf16.msra.mxu1 %v1533_v29  ;;  %v1514_v51 = vmax.f32 %v1472_v18, 0.0 }
 0x2c2   : > { %v1478_v48 = vadd.f32 %v1477_v52, %v1285_v25  ;;  %v1515_v57 = vmax.f32 %v1474_v4, 0.0 }
 0x2c3   : > { %v1516_v9 = vmax.f32 %v1476_v63, 0.0 }
 0x2c4   : > { %v1517_v16 = vmax.f32 %v1478_v48, 0.0 }
 0x2c5   : > { %v1535_v1 = vpack.c.bf16 %v1516_v9, %v1514_v51 }
 0x2c6   : > { %v1536_v28 = vpack.c.bf16 %v1517_v16, %v1515_v57  ;;  %v1481_v55 = vpop.f32.mrb[28].mxu0 }
 0x2c7   : > { %v1482_v19 = vadd.f32 %v1481_v55, %v1290_v34  ;;  %v1483_v12 = vpop.f32.mrb[29].mxu0 }
 0x2c8   : > { %v1484_v0 = vadd.f32 %v1483_v12, %v1290_v34  ;;  %v1485_v46 = vpop.f32.mrb[30].mxu0  ;;  %1561 = vmatprep.subr.bf16.mxu1 %v1536_v28 }
 0x2c9   : > { %v1486_v10 = vadd.f32 %v1485_v46, %v1295_v8  ;;  %v1487_v15 = vpop.f32.mrb[31].mxu0  ;;  %1562 = vmatpush1.bf16.msra.mxu1 %v1535_v1  ;;  %v1518_v38 = vmax.f32 %v1482_v19, 0.0 }
 0x2ca   : > { %v1488_v3 = vadd.f32 %v1487_v15, %v1295_v8  ;;  %v1519_v42 = vmax.f32 %v1484_v0, 0.0 }
 0x2cb   : > { %v1520_v39 = vmax.f32 %v1486_v10, 0.0 }
 0x2cc   : > { %v1521_v27 = vmax.f32 %v1488_v3, 0.0 }
 0x2cd   : > { %v1537_v53 = vpack.c.bf16 %v1520_v39, %v1518_v38 }
 0x2ce   : > { %v1538_v26 = vpack.c.bf16 %v1521_v27, %v1519_v42 }
 0x2d0   : > { %1563 = vmatprep.subr.bf16.mxu1 %v1538_v26 }
 0x2d1   : > { %1564 = vmatpush1.bf16.msra.mxu1 %v1537_v53 }
 0x2d4   : > { %1582 = vmatmul.mubr.bf16.vlgmr.msra.gmra.mrb[0].mxu1 %v1522_v49 }
 0x3a7   : > { %v1583_v14 = vpop.f32.mrb[0].mxu1 }
 0x3a8   : > { %v1584_v23 = vadd.f32 %v1583_v14, %v1548_v20  ;;  %v1585_v31 = vpop.f32.mrb[1].mxu1 }
 0x3a9   : > { %v1586_v58 = vadd.f32 %v1585_v31, %v1548_v20  ;;  %v1587_v21 = vpop.f32.mrb[2].mxu1 }
 0x3aa   : > { %v1590_v37 = vsub.f32 0.0, %v1584_v23  ;;  %v1588_v43 = vpop.f32.mrb[3].mxu1 }
 0x3ab   : > { %v1591_v44 = vsub.f32 0.0, %v1586_v58 }
 0x3ac   : > { %v1592_v35 = vmul.f32 1.442695, %v1590_v37 }
 0x3ad   : > { %v1594_v47 = vmul.f32 1.442695, %v1591_v44 }
 0x3ae   : > { %1828 = vpow2.f32 %v1592_v35 }
 0x3af   : > { %1830 = vpow2.f32 %v1594_v47 }
 0x3b8   : > { %v1829_v54 = vpop.eup %1828 }
 0x3b9   : > { %v1831_v32 = vpop.eup %1830  ;;  %v1596_v17 = vadd.f32 1.0, %v1829_v54 }
 0x3ba   : > { %v1597_v2 = vadd.f32 1.0, %v1831_v32 }
 0x3bb   : > { %1832 = vrcp.f32 %v1596_v17 }
 0x3bc   : > { %1834 = vrcp.f32 %v1597_v2 }
 0x3c5   : > { %v1833_v56 = vpop.eup %1832 }
 0x3c6   : > { %v1835_v24 = vpop.eup %1834 }
 0x3c7   : > { %v1604_v40 = vcombine.low %v1833_v56, %v1835_v24 }
 0x3c9   : > { %v1611_v5 = vrot.slane %v1604_v40, %v1610_v62 }
 0x3cb   : > { %v1618_v22 = vrot.slane %v1611_v5, %v1610_v62 }
 0x3cd   : > { %1624 = vst.msk [vmem:[%s274_s21] sm:$0x3] %vm1622_vm0, %v1618_v22 }
 0x3ce   : > { %1849 = shalt.err (!%p1846_p3)
}
 0x3cf   : > { %s1850_s15 = scalar_lea.hbm %s2673_s25, 32  ;;  %s1854_s18 = scalar_lea.hbm %s2722_s7, 64 }
 0x3d0   : > { %p1851_p4 = scmp.ne.s32.totalorder %s2673_s25, %s1850_s15  ;;  %p1855_p9 = scmp.lt.u32.totalorder %s2673_s25, %s2722_s7 }
 0x3d1   : > { %p1856_p10 = scmp.lt.u32.totalorder %s1854_s18, %s1850_s15  ;;  %p1858_p12 = scmp.lt.u32.totalorder %s1850_s15, %s2673_s25 }
 0x3d2   : > { %p1852_p7 = pnand %p1851_p4, %p1985_p5 }
 0x3d3   : > { %p1857_p11 = por %p1856_p10, %p1855_p9 }
 0x3d4   : > { %p1853_p8 = pneg %p1852_p7 }
 0x3d5   : > { %p1859_p13 = por %p1858_p12, %p1857_p11 }
 0x3d7   : > { %p1860_p0 = pnand %p1859_p13, %p1853_p8 }
 0x3d9   : > { %1863 = shalt.err (!%p1860_p0)
}
 0x3da   : > { %1728 = dma.vmem_to_hbm [thread:$0]  (%p1985_p5), %s2675_s22, 32, %s2673_s25, %s1626_s30  }
 0x3db PF: > { %p1734_p1 = scmp.ge.s32.totalorder %s1898_s29, 2  ;;  %s1652_s21 = sand.u32 1, %s1886_s26  }
 0x3dc   : > { %s1653_s23 = scalar_lea.sflag [#allocation4], %s1652_s21 }
 0x3dd   : > { %p1731_p2 = pnand %p1734_p1, %p1989_p6 }
 0x3df   : > { %1881 = dma.done.wait (!%p1731_p2), %s1653_s23, 32  }
 0x3e0   : > { %1883 = vsyncadd (!%p1731_p2), %s1653_s23, 4294967264  ;;  %p19_p3 = scmp.ge.s32.totalorder %s1972_s8, 4   ;;  %s2754_s26 = smov %s1890_s27 }
 0x3e1   : > { %s2755_s27 = smov %s1894_s28  ;;  %s2756_s28 = smov %s1983_s11 }
 0x3e2   : > { %s2757_s29 = smov %s1972_s8  ;;  %21 = sbr.rel (!%p19_p3) target bundleno = 6 (0x6), region = 83 }
 0x3e9   :  { %1658 = vsyncpa [#allocation4], 1 }
 0x3ea   :  { %1660 = vsyncpa [#allocation4 + $0x1], 1 }

</bundles_post_ra>
